<compile_context>
chip_gen: v6e
topology: v6e:2x2x1
jax: 0.10.0
libtpu: 0.0.40
codegen_flags: <defaults>
</compile_context>

<pallas_src>
import functools

import jax
import jax.numpy as jnp
from jax import lax
from jax.experimental import pallas as pl
from jax.experimental.pallas import tpu as pltpu


_IN_FEATURES = 4     # fc1: Linear(4, 128)
_HIDDEN = 128
_ACTIONS = 2         # fc2: Linear(128, 2)
_PAD_ACT = 8         # fc2 weight rows padded to one sublane tile


def _logits_kernel(nvalid_ref, xT_ref, w1_ref, b1_ref, w2p_ref, b2p_ref, o_ref):
    """Per batch tile: logits[a, b] for columns of this tile (transposed layout)."""
    i = pl.program_id(0)
    tb = xT_ref.shape[1]

    xT = xT_ref[...]          # (4, tb)   f32, lane-dense in batch
    w1 = w1_ref[...]          # (128, 4)  f32, PyTorch (out, in) layout

    # fc1 (K=4): four VPU rank-1 updates.  x rows broadcast along sublanes
    # (cheap); using the MXU here would be <4% utilized.
    h = w1[:, 0:1] * xT[0:1, :]
    for k in range(1, _IN_FEATURES):
        h = h + w1[:, k:k + 1] * xT[k:k + 1, :]
    h = jnp.maximum(h + b1_ref[...], 0.0)                       # (128, tb)

    # fc2: one MXU matmul against the 8-row zero-padded weights.
    logits = jnp.dot(w2p_ref[...], h,
                     preferred_element_type=jnp.float32) + b2p_ref[...]   # (8, tb)

    # Mask padded batch columns so they contribute nothing to the dim-0 softmax.
    cols = i * tb + lax.broadcasted_iota(jnp.int32, (1, tb), 1)
    logits = jnp.where(cols < nvalid_ref[0], logits, jnp.float32(-1e30))

    # Store only the 2 real action rows; batch (lanes) stays dense.
    o_ref[...] = logits[:_ACTIONS, :]                           # (2, tb)


def _softmax_dim0_kernel(z_ref, o_ref):
    """softmax over dim=0 of the (B, 2) logits == lane-axis softmax per action row."""
    z = z_ref[...]                                   # (2, b_pad)
    m = jnp.max(z, axis=1, keepdims=True)            # (2, 1)  XLU lane reduce
    e = jnp.exp(z - m)                               # masked cols: exp(-1e30-m) -> 0
    denom = jnp.sum(e, axis=1, keepdims=True)        # (2, 1)
    # Exact reciprocal; approx=True (~2^-12 rel err) would miss the 1e-5 tol.
    o_ref[...] = e * pl.reciprocal(denom)


@functools.partial(jax.jit, static_argnames=("tb",))
def policy_forward(x, fc1_w, fc1_b, fc2_w, fc2_b, *, tb=512):
    """x: (B, 4) f32 -> (B, 2) f32 probabilities (softmax over dim=0).

    Weights use the PyTorch layout: fc1_w (128,4), fc1_b (128,), fc2_w (2,128), fc2_b (2,).
    """
    assert tb % 128 == 0, "batch tile must be a multiple of the 128-lane width"
    B = x.shape[0]
    n_steps = pl.cdiv(B, tb)
    b_pad = n_steps * tb
    # Single-step softmax epilogue holds the (2, b_pad) slab in VMEM
    # (~16-24 B/row incl. temps); this guard keeps it well inside the smallest
    # default scoped-VMEM budget (16 MiB on v5e).  Chunk the epilogue for more.
    assert b_pad <= (1 << 18), "rollout too large for single-step softmax epilogue"

    # Transposed, zero-padded operands (all tiny relative to the kernel work).
    xTp = jnp.pad(x.astype(jnp.float32).T, ((0, 0), (0, b_pad - B)))          # (4, b_pad)
    w1f = fc1_w.astype(jnp.float32)                                           # (128, 4)
    b1c = fc1_b.astype(jnp.float32).reshape(_HIDDEN, 1)                       # (128, 1)
    w2p = jnp.pad(fc2_w.astype(jnp.float32),
                  ((0, _PAD_ACT - _ACTIONS), (0, 0)))                         # (8, 128)
    b2p = jnp.pad(fc2_b.astype(jnp.float32).reshape(_ACTIONS, 1),
                  ((0, _PAD_ACT - _ACTIONS), (0, 0)))                         # (8, 1)
    nvalid = jnp.array([B], jnp.int32)

    # Pass 1: batch-tiled logits, grid axis fully parallel (v7x megacore OK).
    logits_pad = pl.pallas_call(
        _logits_kernel,
        out_shape=jax.ShapeDtypeStruct((_ACTIONS, b_pad), jnp.float32),
        grid_spec=pltpu.PrefetchScalarGridSpec(
            num_scalar_prefetch=1,          # true batch size (column mask) in SMEM
            grid=(n_steps,),
            in_specs=[
                # x tile streamed per grid step (lane-dense in batch).
                pl.BlockSpec((_IN_FEATURES, tb), lambda i, n: (0, i)),
                # Weights: constant block index -> DMA'd once, VMEM-resident.
                pl.BlockSpec((_HIDDEN, _IN_FEATURES), lambda i, n: (0, 0)),
                pl.BlockSpec((_HIDDEN, 1), lambda i, n: (0, 0)),
                pl.BlockSpec((_PAD_ACT, _HIDDEN), lambda i, n: (0, 0)),
                pl.BlockSpec((_PAD_ACT, 1), lambda i, n: (0, 0)),
            ],
            out_specs=pl.BlockSpec((_ACTIONS, tb), lambda i, n: (0, i)),
        ),
        compiler_params=pltpu.CompilerParams(
            dimension_semantics=("parallel",),
        ),
    )(nvalid, xTp, w1f, b1c, w2p, b2p)

    # Pass 2: dim-0 softmax over the compact (2, b_pad) slab (negligible work).
    probs_pad = pl.pallas_call(
        _softmax_dim0_kernel,
        out_shape=jax.ShapeDtypeStruct((_ACTIONS, b_pad), jnp.float32),
        grid=(1,),
        in_specs=[pl.BlockSpec((_ACTIONS, b_pad), lambda i: (0, 0))],
        out_specs=pl.BlockSpec((_ACTIONS, b_pad), lambda i: (0, 0)),
        compiler_params=pltpu.CompilerParams(
            dimension_semantics=("arbitrary",),
        ),
    )(logits_pad)

    # Tiny (2, B) slice + transpose -> (B, 2); 8 B/row, no padded-slab round trip.
    return probs_pad[:, :B].T


def init_params(key):
    """Deterministic init with the module's PyTorch shapes."""
    k1, k2, k3, k4 = jax.random.split(key, 4)
    fc1_w = jax.random.normal(k1, (_HIDDEN, _IN_FEATURES), jnp.float32) * 0.1
    fc1_b = jax.random.normal(k2, (_HIDDEN,), jnp.float32) * 0.01
    fc2_w = jax.random.normal(k3, (_ACTIONS, _HIDDEN), jnp.float32) * 0.1
    fc2_b = jax.random.normal(k4, (_ACTIONS,), jnp.float32) * 0.01
    return fc1_w, fc1_b, fc2_w, fc2_b


def _reference(x, fc1_w, fc1_b, fc2_w, fc2_b):
    h = jnp.maximum(x @ fc1_w.T + fc1_b, 0.0)
    logits = h @ fc2_w.T + fc2_b
    return jax.nn.softmax(logits, axis=0)   # dim=0, same as the torch module


if __name__ == "__main__":
    key = jax.random.PRNGKey(0)
    kx, kp = jax.random.split(key)

    # Small rollout of CartPole-style observations (4 features each).
    # Deliberately not a multiple of the batch tile to exercise masking.
    B = 200
    x = jax.random.normal(kx, (B, _IN_FEATURES), jnp.float32)
    params = init_params(kp)
    ref = _reference(x, *params)

    # Default tile (tb=512): single grid step.
    out = jax.block_until_ready(policy_forward(x, *params))
    assert out.shape == (B, _ACTIONS)
    assert jnp.allclose(out, ref, atol=1e-5, rtol=1e-5), "mismatch vs reference (tb=512)"

    # Small tile (tb=128): two grid steps -> exercises the parallel multi-tile
    # path and the padded-column masking.
    out_small = jax.block_until_ready(policy_forward(x, *params, tb=128))
    assert jnp.allclose(out_small, ref, atol=1e-5, rtol=1e-5), "mismatch vs reference (tb=128)"

    print("KERNEL_OK")
</pallas_src>

<mosaic_0001>
module attributes {stable_mosaic.version = 11 : i64} {
  func.func @_softmax_dim0_kernel(%arg0: i32, %arg1: memref<2x512xf32, #tpu.memory_space<vmem>>, %arg2: memref<2x512xf32, #tpu.memory_space<vmem>>) attributes {dimension_semantics = [#tpu.dimension_semantics<arbitrary>], iteration_bounds = array<i64: 1>, scalar_prefetch = 0 : i64, scratch_operands = 0 : i64, tpu.core_type = #tpu.core_type<tc>, window_params = [{pipeline_mode = #tpu.pipeline_mode<synchronous>, transform_indices = @transform_0, window_bounds = array<i64: 2, 512>}, {pipeline_mode = #tpu.pipeline_mode<synchronous>, transform_indices = @transform_1, window_bounds = array<i64: 2, 512>}]} {
    %c0 = arith.constant 0 : index
    %c0_0 = arith.constant 0 : index
    %0 = vector.load %arg1[%c0, %c0_0] : memref<2x512xf32, #tpu.memory_space<vmem>>, vector<2x512xf32>
    %cst = arith.constant dense<0xFF800000> : vector<2xf32>
    %1 = vector.multi_reduction <maximumf>, %0, %cst [1] : vector<2x512xf32> to vector<2xf32>
    %2 = vector.shape_cast %1 : vector<2xf32> to vector<2x1xf32>
    %3 = vector.broadcast %2 : vector<2x1xf32> to vector<2x512xf32>
    %4 = arith.subf %0, %3 : vector<2x512xf32>
    %5 = math.exp %4 : vector<2x512xf32>
    %cst_1 = arith.constant dense<0.000000e+00> : vector<2xf32>
    %6 = vector.multi_reduction <add>, %5, %cst_1 [1] : vector<2x512xf32> to vector<2xf32>
    %7 = vector.shape_cast %6 : vector<2xf32> to vector<2x1xf32>
    %8 = tpu.reciprocal %7 : vector<2x1xf32> -> vector<2x1xf32>
    %9 = vector.broadcast %8 : vector<2x1xf32> to vector<2x512xf32>
    %10 = arith.mulf %5, %9 : vector<2x512xf32>
    %c0_2 = arith.constant 0 : index
    %c0_3 = arith.constant 0 : index
    %11 = vector.load %arg2[%c0_2, %c0_3] : memref<2x512xf32, #tpu.memory_space<vmem>>, vector<2x512xf32>
    tpu.vector_store %arg2[%c0_2, %c0_3], %10 {strides = array<i32>} : memref<2x512xf32, #tpu.memory_space<vmem>>, vector<2x512xf32>,
    return
  }
  func.func @transform_0(%arg0: i32) -> (i32, i32) {
    %c0_i32 = arith.constant 0 : i32
    %c0_i32_0 = arith.constant 0 : i32
    %c0_i32_1 = arith.constant 0 : i32
    return %c0_i32, %c0_i32_0 : i32, i32
  }
  func.func @transform_1(%arg0: i32) -> (i32, i32) {
    %c0_i32 = arith.constant 0 : i32
    %c0_i32_0 = arith.constant 0 : i32
    %c0_i32_1 = arith.constant 0 : i32
    return %c0_i32, %c0_i32_0 : i32, i32
  }
}

module attributes {stable_mosaic.version = 11 : i64} {
  func.func @_logits_kernel(%arg0: i32, %arg1: memref<1xi32, #tpu.memory_space<smem>>, %arg2: memref<4x512xf32, #tpu.memory_space<vmem>>, %arg3: memref<128x4xf32, #tpu.memory_space<vmem>>, %arg4: memref<128x1xf32, #tpu.memory_space<vmem>>, %arg5: memref<8x128xf32, #tpu.memory_space<vmem>>, %arg6: memref<8x1xf32, #tpu.memory_space<vmem>>, %arg7: memref<2x512xf32, #tpu.memory_space<vmem>>) attributes {dimension_semantics = [#tpu.dimension_semantics<parallel>], iteration_bounds = array<i64: 1>, scalar_prefetch = 1 : i64, scratch_operands = 0 : i64, tpu.core_type = #tpu.core_type<tc>, window_params = [{transform_indices = @transform_0, window_bounds = array<i64: 4, 512>}, {pipeline_mode = #tpu.pipeline_mode<synchronous>, transform_indices = @transform_1, window_bounds = array<i64: 128, 4>}, {pipeline_mode = #tpu.pipeline_mode<synchronous>, transform_indices = @transform_2, window_bounds = array<i64: 128, 1>}, {pipeline_mode = #tpu.pipeline_mode<synchronous>, transform_indices = @transform_3, window_bounds = array<i64: 8, 128>}, {pipeline_mode = #tpu.pipeline_mode<synchronous>, transform_indices = @transform_4, window_bounds = array<i64: 8, 1>}, {transform_indices = @transform_5, window_bounds = array<i64: 2, 512>}]} {
    %c0 = arith.constant 0 : index
    %c0_0 = arith.constant 0 : index
    %0 = vector.load %arg2[%c0, %c0_0] : memref<4x512xf32, #tpu.memory_space<vmem>>, vector<4x512xf32>
    %c0_1 = arith.constant 0 : index
    %c0_2 = arith.constant 0 : index
    %1 = vector.load %arg3[%c0_1, %c0_2] : memref<128x4xf32, #tpu.memory_space<vmem>>, vector<128x4xf32>
    %2 = vector.extract_strided_slice %1 {offsets = [0, 0], sizes = [128, 1], strides = [1, 1]} : vector<128x4xf32> to vector<128x1xf32>
    %3 = vector.extract_strided_slice %0 {offsets = [0, 0], sizes = [1, 512], strides = [1, 1]} : vector<4x512xf32> to vector<1x512xf32>
    %4 = vector.broadcast %2 : vector<128x1xf32> to vector<128x512xf32>
    %5 = vector.broadcast %3 : vector<1x512xf32> to vector<128x512xf32>
    %6 = arith.mulf %4, %5 : vector<128x512xf32>
    %7 = vector.extract_strided_slice %1 {offsets = [0, 1], sizes = [128, 1], strides = [1, 1]} : vector<128x4xf32> to vector<128x1xf32>
    %8 = vector.extract_strided_slice %0 {offsets = [1, 0], sizes = [1, 512], strides = [1, 1]} : vector<4x512xf32> to vector<1x512xf32>
    %9 = vector.broadcast %7 : vector<128x1xf32> to vector<128x512xf32>
    %10 = vector.broadcast %8 : vector<1x512xf32> to vector<128x512xf32>
    %11 = arith.mulf %9, %10 : vector<128x512xf32>
    %12 = arith.addf %6, %11 : vector<128x512xf32>
    %13 = vector.extract_strided_slice %1 {offsets = [0, 2], sizes = [128, 1], strides = [1, 1]} : vector<128x4xf32> to vector<128x1xf32>
    %14 = vector.extract_strided_slice %0 {offsets = [2, 0], sizes = [1, 512], strides = [1, 1]} : vector<4x512xf32> to vector<1x512xf32>
    %15 = vector.broadcast %13 : vector<128x1xf32> to vector<128x512xf32>
    %16 = vector.broadcast %14 : vector<1x512xf32> to vector<128x512xf32>
    %17 = arith.mulf %15, %16 : vector<128x512xf32>
    %18 = arith.addf %12, %17 : vector<128x512xf32>
    %19 = vector.extract_strided_slice %1 {offsets = [0, 3], sizes = [128, 1], strides = [1, 1]} : vector<128x4xf32> to vector<128x1xf32>
    %20 = vector.extract_strided_slice %0 {offsets = [3, 0], sizes = [1, 512], strides = [1, 1]} : vector<4x512xf32> to vector<1x512xf32>
    %21 = vector.broadcast %19 : vector<128x1xf32> to vector<128x512xf32>
    %22 = vector.broadcast %20 : vector<1x512xf32> to vector<128x512xf32>
    %23 = arith.mulf %21, %22 : vector<128x512xf32>
    %24 = arith.addf %18, %23 : vector<128x512xf32>
    %c0_3 = arith.constant 0 : index
    %c0_4 = arith.constant 0 : index
    %25 = vector.load %arg4[%c0_3, %c0_4] : memref<128x1xf32, #tpu.memory_space<vmem>>, vector<128x1xf32>
    %26 = vector.broadcast %25 : vector<128x1xf32> to vector<128x512xf32>
    %27 = arith.addf %24, %26 : vector<128x512xf32>
    %cst = arith.constant 0.000000e+00 : f32
    %28 = vector.broadcast %cst : f32 to vector<128x512xf32>
    %29 = arith.maximumf %27, %28 : vector<128x512xf32>
    %c0_5 = arith.constant 0 : index
    %c0_6 = arith.constant 0 : index
    %30 = vector.load %arg5[%c0_5, %c0_6] : memref<8x128xf32, #tpu.memory_space<vmem>>, vector<8x128xf32>
    %cst_7 = arith.constant dense<0.000000e+00> : vector<8x512xf32>
    %31 = tpu.matmul %30, %29, %cst_7 {dimension_numbers = #tpu.dot_dimension_numbers<[1], [0], [0], [1], [0, 0, 1, 1], [], []>} : vector<8x128xf32>, vector<128x512xf32>, vector<8x512xf32> -> vector<8x512xf32>
    %c0_8 = arith.constant 0 : index
    %c0_9 = arith.constant 0 : index
    %32 = vector.load %arg6[%c0_8, %c0_9] : memref<8x1xf32, #tpu.memory_space<vmem>>, vector<8x1xf32>
    %33 = vector.broadcast %32 : vector<8x1xf32> to vector<8x512xf32>
    %34 = arith.addf %31, %33 : vector<8x512xf32>
    %c512_i32 = arith.constant 512 : i32
    %35 = arith.muli %arg0, %c512_i32 : i32
    %36 = tpu.iota {dimensions = array<i32: 1>} : vector<1x512xi32>
    %37 = vector.broadcast %35 : i32 to vector<1x512xi32>
    %38 = arith.addi %37, %36 : vector<1x512xi32>
    %c0_10 = arith.constant 0 : index
    %39 = memref.load %arg1[%c0_10] : memref<1xi32, #tpu.memory_space<smem>>
    %40 = vector.broadcast %39 : i32 to vector<1x512xi32>
    %41 = arith.cmpi slt, %38, %40 : vector<1x512xi32>
    %cst_11 = arith.constant -1.000000e+30 : f32
    %42 = vector.shape_cast %41 : vector<1x512xi1> to vector<1x512xi1>
    %43 = vector.broadcast %42 : vector<1x512xi1> to vector<8x512xi1>
    %44 = vector.broadcast %cst_11 : f32 to vector<8x512xf32>
    %45 = arith.select %43, %34, %44 : vector<8x512xi1>, vector<8x512xf32>
    %46 = vector.extract_strided_slice %45 {offsets = [0, 0], sizes = [2, 512], strides = [1, 1]} : vector<8x512xf32> to vector<2x512xf32>
    %c0_12 = arith.constant 0 : index
    %c0_13 = arith.constant 0 : index
    %47 = vector.load %arg7[%c0_12, %c0_13] : memref<2x512xf32, #tpu.memory_space<vmem>>, vector<2x512xf32>
    tpu.vector_store %arg7[%c0_12, %c0_13], %46 {strides = array<i32>} : memref<2x512xf32, #tpu.memory_space<vmem>>, vector<2x512xf32>,
    return
  }
  func.func @transform_0(%arg0: i32, %arg1: memref<1xi32, #tpu.memory_space<smem>>) -> (i32, i32) {
    %c0_i32 = arith.constant 0 : i32
    %c0_i32_0 = arith.constant 0 : i32
    return %c0_i32, %arg0 : i32, i32
  }
  func.func @transform_1(%arg0: i32, %arg1: memref<1xi32, #tpu.memory_space<smem>>) -> (i32, i32) {
    %c0_i32 = arith.constant 0 : i32
    %c0_i32_0 = arith.constant 0 : i32
    %c0_i32_1 = arith.constant 0 : i32
    return %c0_i32, %c0_i32_0 : i32, i32
  }
  func.func @transform_2(%arg0: i32, %arg1: memref<1xi32, #tpu.memory_space<smem>>) -> (i32, i32) {
    %c0_i32 = arith.constant 0 : i32
    %c0_i32_0 = arith.constant 0 : i32
    %c0_i32_1 = arith.constant 0 : i32
    return %c0_i32, %c0_i32_0 : i32, i32
  }
  func.func @transform_3(%arg0: i32, %arg1: memref<1xi32, #tpu.memory_space<smem>>) -> (i32, i32) {
    %c0_i32 = arith.constant 0 : i32
    %c0_i32_0 = arith.constant 0 : i32
    %c0_i32_1 = arith.constant 0 : i32
    return %c0_i32, %c0_i32_0 : i32, i32
  }
  func.func @transform_4(%arg0: i32, %arg1: memref<1xi32, #tpu.memory_space<smem>>) -> (i32, i32) {
    %c0_i32 = arith.constant 0 : i32
    %c0_i32_0 = arith.constant 0 : i32
    %c0_i32_1 = arith.constant 0 : i32
    return %c0_i32, %c0_i32_0 : i32, i32
  }
  func.func @transform_5(%arg0: i32, %arg1: memref<1xi32, #tpu.memory_space<smem>>) -> (i32, i32) {
    %c0_i32 = arith.constant 0 : i32
    %c0_i32_0 = arith.constant 0 : i32
    return %c0_i32, %arg0 : i32, i32
  }
}

</mosaic_0001>

<bundles_post_ra>
// kernel: policy_forward.3
= control target key start
LH: loop header
LB: loop body
LE: loop exit
PB: predicated region body
PF: predicated region fallthrough
CT: control target
= control target key end

     0   :  { %v14_v0 = vlaneseq  ;;  %v107_v2 = vmov 1983009808   ;;  %vm31_vm0 = vcmask 1041408   ;;  %v108_v19 = vmov 269488144   ;;  %s133_s0 = inlined_call_operand.vmem [shape: f32[2,512], index: 0, kind: input, shape index: {}]   ;;  %s134_s1 = inlined_call_operand.vmem [shape: f32[2,512], index: 1, kind: output, shape index: {}]  }
   0x1   :  { %v8_v1 = vld [vmem:[%s133_s0] sm:$0xff]  ;;  %v12_v3 = vunpack.c.l.s4 %v107_v2  ;;  %v43_v20 = vunpack.c.l.s4 %v108_v19 }
   0x2   :  { %v15_v4 = vshrl.u32 %v14_v0, 7  ;;  %v10_v5 = vcombine.high %v8_v1, %v8_v1 }
   0x3   :  { %v13_v6 = vunpack.c.0.s8 %v12_v3  ;;  %v44_v21 = vunpack.c.0.s8 %v43_v20 }
   0x5   :  { %v16_v7 = vsub.s32 %v13_v6, %v15_v4  ;;  %v47_v22 = vsub.s32 %v44_v21, %v15_v4 }
   0x7   :  { %v17_v8 = vrot.slane %v8_v1, %v16_v7  ;;  %v24_v9 = vrot.slane %v10_v5, %v16_v7 }
   0x9   :  { %v25_v10 = vcombine.high %v17_v8, %v17_v8  ;;  %v26_v11 = vcombine.high %v24_v9, %v24_v9  ;;  %v32_v12 = vsel %vm31_vm0, %v17_v8, -inf  ;;  %v34_v13 = vsel %vm31_vm0, %v24_v9, -inf }
   0xb   :  { %v33_v14 = vsel %vm31_vm0, %v25_v10, -inf  ;;  %v35_v15 = vsel %vm31_vm0, %v26_v11, -inf }
   0xc   :  { %v36_v16 = vmax.f32 %v32_v12, %v33_v14  ;;  %v37_v17 = vmax.f32 %v34_v13, %v35_v15 }
   0xe   :  { %v38_v18 = vmax.f32 %v36_v16, %v37_v17 }
  0x10   :  { %39 = vmax.xlane.f32.xlu0 %v38_v18 }
  0x99   :  { %v40_v23 = vpop.xlane.xlu0 %39 }
  0x9a   :  { %v48_v24 = vrot.slane %v40_v23, %v47_v22 }
  0x9c   :  { %v50_v25 = vsub.f32 %v8_v1, %v48_v24 }
  0x9e   :  { %v51_v26 = vmul.f32 1.442695, %v50_v25 }
  0xa0   :  { %103 = vpow2.f32 %v51_v26 }
  0xad   :  { %v104_v27 = vpop.eup %103 }
  0xae   :  { %v54_v28 = vcombine.high %v104_v27, %v104_v27  ;;  %v61_v29 = vrot.slane %v104_v27, %v16_v7 }
  0xb0   :  { %v68_v30 = vrot.slane %v54_v28, %v16_v7  ;;  %v69_v31 = vcombine.high %v61_v29, %v61_v29  ;;  %v75_v33 = vsel %vm31_vm0, %v61_v29, 0.0 }
  0xb2   :  { %v70_v32 = vcombine.high %v68_v30, %v68_v30  ;;  %v76_v34 = vsel %vm31_vm0, %v69_v31, 0.0  ;;  %v78_v36 = vsel %vm31_vm0, %v68_v30, 0.0 }
  0xb3   :  { %v77_v35 = vadd.f32 %v76_v34, %v75_v33 }
  0xb4   :  { %v80_v38 = vsel %vm31_vm0, %v70_v32, 0.0 }
  0xb5   :  { %v79_v37 = vadd.f32 %v78_v36, %v77_v35 }
  0xb7   :  { %v81_v39 = vadd.f32 %v80_v38, %v79_v37 }
  0xb9   :  { %82 = vadd.xlane.f32.xlu0 %v81_v39 }
 0x142   :  { %v83_v40 = vpop.xlane.xlu0 %82 }
 0x143   :  { %105 = vrcp.f32 %v83_v40 }
 0x150   :  { %v106_v41 = vpop.eup %105 }
 0x151   :  { %v92_v42 = vrot.slane %v106_v41, %v47_v22 }
 0x153   :  { %v94_v43 = vmul.f32 %v104_v27, %v92_v42 }
 0x155   :  { %95 = vst [vmem:[%s134_s1] sm:$0xff] %v94_v43 }

// kernel: policy_forward.2
= control target key start
LH: loop header
LB: loop body
LE: loop exit
PB: predicated region body
PF: predicated region fallthrough
CT: control target
= control target key end

     0   :  { %v2574_v0 = vmov 1   ;;  %v2570_v1 = vmov 0   ;;  %v2572_v12 = vmov 3   ;;  %v2568_v15 = vmov 2   ;;  %s2560_s2 = inlined_call_operand.vmem [shape: f32[128,4], index: 2, kind: input, shape index: {}]   ;;  %s2561_s3 = inlined_call_operand.vmem [shape: f32[128,1], index: 3, kind: input, shape index: {}]   ;;  %s2562_s5 = inlined_call_operand.vmem [shape: f32[8,1], index: 5, kind: input, shape index: {}]   ;;  %s2563_s1 = inlined_call_operand.vmem [shape: f32[4,512], index: 1, kind: input, shape index: {}]   ;;  %s2564_s4 = inlined_call_operand.vmem [shape: f32[8,128], index: 4, kind: input, shape index: {}]   ;;  %s2565_s0 = inlined_call_operand.<no memory space> [shape: s32[1], index: 0, kind: input, shape index: {}]   ;;  %s2566_s6 = inlined_call_operand.vmem [shape: f32[2,512], index: 6, kind: output, shape index: {}]  }
   0x1   :  { %1355 = vset.pattern.permute.xlu0 %v2574_v0  ;;  %1341 = vset.pattern.permute.xlu1 %v2570_v1  ;;  %v1437_v2 = vld [vmem:[%s2560_s2 + $0x48] sm:$0xff]  ;;  %v1442_v3 = vld [vmem:[%s2560_s2 + $0x10] sm:$0xff]  ;;  %v1454_v5 = vld [vmem:[%s2560_s2 + $0x18] sm:$0xff]  ;;  %v2567_v48 = vlaneseq }
   0x2   :  { %2604 = vst [vmem:[#allocation4_spill] sm:$0xff] %v1442_v3  ;;  %259 = vperm.xlu0 %1355, %v1437_v2   ;;  %52 = vperm.xlu1 %1341, %v1442_v3   ;;  %v1449_v4 = vld [vmem:[%s2560_s2 + $0x30] sm:$0xff]  ;;  %v1461_v6 = vld [vmem:[%s2560_s2 + $0x78] sm:$0xff]  ;;  %v1474_v8 = vld [vmem:[%s2560_s2] sm:$0xff] }
   0x3   :  { %v1469_v7 = vld [vmem:[%s2560_s2 + $0x70] sm:$0xff]  ;;  %2605 = vst [vmem:[#allocation5_spill] sm:$0xff] %v1474_v8  ;;  %v1482_v9 = vld [vmem:[%s2560_s2 + $0x8] sm:$0xff]  ;;  %v36_v11 = vld [vmem:[%s2560_s2 + $0x60] sm:$0xff]  ;;  %v1642_v51 = vshrl.u32 %v2567_v48, 7 }
   0x4   :  { %2606 = vst [vmem:[#allocation6_spill] sm:$0xff] %v1482_v9  ;;  %v37_v10 = vld [vmem:[%s2560_s2 + $0x68] sm:$0xff]  ;;  %v34_v13 = vld [vmem:[%s2560_s2 + $0x50] sm:$0xff]  ;;  %v1508_v16 = vld [vmem:[%s2560_s2 + $0x38] sm:$0xff] }
   0x5   :  { %v919_v14 = vld [vmem:[%s2561_s3 + $0x68] sm:$0xff]  ;;  %v35_v17 = vld [vmem:[%s2560_s2 + $0x58] sm:$0xff]  ;;  %v916_v18 = vld [vmem:[%s2561_s3 + $0x50] sm:$0xff]  ;;  %2614 = vst [vmem:[#allocation14_spill] sm:$0xff] %v1642_v51  ;;  %v288_v53 = vsub.s32 1, %v1642_v51  ;;  %v292_v54 = vsub.s32 5, %v1642_v51 }
   0x6   :  { %247 = vperm.xlu0 %1355, %v1449_v4   ;;  %57 = vperm.xlu1 %1341, %v1454_v5   ;;  %v1521_v19 = vld [vmem:[%s2560_s2 + $0x20] sm:$0xff]  ;;  %v912_v20 = vld [vmem:[%s2561_s3 + $0x30] sm:$0xff]  ;;  %v921_v21 = vld [vmem:[%s2561_s3 + $0x78] sm:$0xff]  ;;  %v124_v56 = vsub.s32 0, %v1642_v51  ;;  %v128_v57 = vsub.s32 4, %v1642_v51  ;;  %v744_v60 = vsub.s32 3, %v1642_v51 }
   0x7   :  { %v920_v22 = vld [vmem:[%s2561_s3 + $0x70] sm:$0xff]  ;;  %v32_v23 = vld [vmem:[%s2560_s2 + $0x40] sm:$0xff]  ;;  %v909_v25 = vld [vmem:[%s2561_s3 + $0x18] sm:$0xff]  ;;  %v748_v63 = vsub.s32 7, %v1642_v51 }
   0x8   :  { %v918_v24 = vld [vmem:[%s2561_s3 + $0x60] sm:$0xff]  ;;  %v907_v26 = vld [vmem:[%s2561_s3 + $0x8] sm:$0xff]  ;;  %v917_v28 = vld [vmem:[%s2561_s3 + $0x58] sm:$0xff] }
   0x9   :  { %v1131_v27 = vld [vmem:[%s2562_s5] sm:$0xff]  ;;  %v1605_v37 = vld [vmem:[%s2560_s2 + $0x28] sm:$0xff] }
   0xa   :  { %231 = vperm.xlu0 %1355, %v1442_v3   ;;  %1342 = vset.pattern.permute.xlu1 %v2574_v0  ;;  %v915_v45 = vld [vmem:[%s2561_s3 + $0x48] sm:$0xff]  ;;  %v22_v58 = vld [vmem:[%s2563_s1] sm:$0xff] }
   0xb   :  { %283 = vperm.xlu1 %1342, %v1461_v6   ;;  %v23_v59 = vld [vmem:[%s2563_s1 + $0x8] sm:$0xff]  ;;  %v914_v62 = vld [vmem:[%s2561_s3 + $0x40] sm:$0xff] }
   0xe   :  { %1377 = vset.pattern.permute.xlu0 %v2570_v1 }
   0xf   :  { %279 = vperm.xlu1 %1342, %v1469_v7   ;;  %42 = vperm.xlu0 %1377, %v1474_v8  }
  0x13   :  { %1343 = vset.pattern.permute.xlu1 %v2570_v1  ;;  %47 = vperm.xlu0 %1377, %v1482_v9  }
  0x14   :  { %107 = vperm.xlu1 %1343, %v37_v10  }
  0x17   :  { %117 = vperm.xlu0 %1377, %v1461_v6  }
  0x18   :  { %1344 = vset.pattern.permute.xlu1 %v2574_v0 }
  0x19   :  { %275 = vperm.xlu1 %1344, %v37_v10  }
  0x1b   :  { %112 = vperm.xlu0 %1377, %v1469_v7  }
  0x1d   :  { %1345 = vset.pattern.permute.xlu1 %v2572_v12 }
  0x1e   :  { %739 = vperm.xlu1 %1345, %v1461_v6  }
  0x1f   :  { %102 = vperm.xlu0 %1377, %v36_v11  }
  0x22   :  { %1346 = vset.pattern.permute.xlu1 %v2574_v0 }
  0x23   :  { %271 = vperm.xlu1 %1346, %v36_v11   ;;  %92 = vperm.xlu0 %1377, %v34_v13  }
  0x27   :  { %1347 = vset.pattern.permute.xlu1 %v2568_v15  ;;  %989 = vperm.xlu0 %1377, %v919_v14   ;;  %v129_v14 = vrot.slane %v22_v58, %v128_v57 }
  0x28   :  { %503 = vperm.xlu1 %1347, %v37_v10  }
  0x2b   :  { %77 = vperm.xlu0 %1377, %v1508_v16  }
  0x2c   :  { %1348 = vset.pattern.permute.xlu1 %v2570_v1 }
  0x2d   :  { %97 = vperm.xlu1 %1348, %v35_v17  }
  0x2f   :  { %974 = vperm.xlu0 %1377, %v916_v18  }
  0x31   :  { %1349 = vset.pattern.permute.xlu1 %v2574_v0 }
  0x32   :  { %267 = vperm.xlu1 %1349, %v35_v17  }
  0x33   :  { %62 = vperm.xlu0 %1377, %v1521_v19  }
  0x36   :  { %1350 = vset.pattern.permute.xlu1 %v2572_v12 }
  0x37   :  { %731 = vperm.xlu1 %1350, %v37_v10   ;;  %954 = vperm.xlu0 %1377, %v912_v20   ;;  %v297_v10 = vrot.slane %v23_v59, %v288_v53  ;;  %v745_v20 = vrot.slane %v22_v58, %v744_v60 }
  0x39   :  { %v1678_v48 = vrot.slane %v297_v10, %v288_v53 }
  0x3b   :  { %1351 = vset.pattern.permute.xlu1 %v2570_v1  ;;  %1380 = vset.pattern.permute.xlu0 %v2572_v12 }
  0x3c   :  { %999 = vperm.xlu1 %1351, %v921_v21   ;;  %735 = vperm.xlu0 %1380, %v1469_v7   ;;  %v753_v21 = vrot.slane %v23_v59, %v744_v60 }
  0x40   :  { %1352 = vset.pattern.permute.xlu1 %v2574_v0  ;;  %727 = vperm.xlu0 %1380, %v36_v11  }
  0x41   :  { %263 = vperm.xlu1 %1352, %v34_v13  }
  0x44   :  { %715 = vperm.xlu0 %1380, %v1437_v2  }
  0x45   :  { %1353 = vset.pattern.permute.xlu1 %v2568_v15 }
  0x46   :  { %495 = vperm.xlu1 %1353, %v35_v17  }
  0x48   :  { %703 = vperm.xlu0 %1380, %v1449_v4  }
  0x4a   :  { %1354 = vset.pattern.permute.xlu1 %v2570_v1 }
  0x4b   :  { %994 = vperm.xlu1 %1354, %v920_v22  }
  0x4c   :  { %691 = vperm.xlu0 %1380, %v1454_v5  }
  0x4f   :  { %87 = vperm.xlu1 %1354, %v1437_v2  }
  0x50   :  { %1383 = vset.pattern.permute.xlu0 %v2568_v15 }
  0x51   :  { %511 = vperm.xlu0 %1383, %v1461_v6   ;;  %v289_v6 = vrot.slane %v22_v58, %v288_v53 }
  0x53   :  { %1356 = vset.pattern.permute.xlu1 %v2568_v15 }
  0x54   :  { %491 = vperm.xlu1 %1356, %v34_v13  }
  0x55   :  { %507 = vperm.xlu0 %1383, %v1469_v7   ;;  %v293_v7 = vrot.slane %v22_v58, %v292_v54 }
  0x58   :  { %1357 = vset.pattern.permute.xlu1 %v2572_v12 }
  0x59   :  { %723 = vperm.xlu1 %1357, %v35_v17   ;;  %499 = vperm.xlu0 %1383, %v36_v11   ;;  %v301_v11 = vrot.slane %v23_v59, %v292_v54  ;;  %v137_v17 = vrot.slane %v23_v59, %v128_v57  ;;  %v1676_v54 = vrot.slane %v293_v7, %v288_v53 }
  0x5b   :  { %v1680_v57 = vrot.slane %v301_v11, %v288_v53 }
  0x5d   :  { %1358 = vset.pattern.permute.xlu1 %v2570_v1  ;;  %487 = vperm.xlu0 %1383, %v1437_v2   ;;  %v516_v2 = vsub.s32 2, %v1642_v51 }
  0x5e   :  { %82 = vperm.xlu1 %1358, %v32_v23  }
  0x61   :  { %475 = vperm.xlu0 %1383, %v1449_v4  }
  0x62   :  { %1359 = vset.pattern.permute.xlu1 %v2574_v0 }
  0x63   :  { %255 = vperm.xlu1 %1359, %v32_v23  }
  0x65   :  { %467 = vperm.xlu0 %1383, %v1521_v19  }
  0x67   :  { %1360 = vset.pattern.permute.xlu1 %v2572_v12 }
  0x68   :  { %719 = vperm.xlu1 %1360, %v34_v13   ;;  %v125_v13 = vrot.slane %v22_v58, %v124_v56 }
  0x69   :  { %455 = vperm.xlu0 %1383, %v1482_v9  }
  0x6c   :  { %1361 = vset.pattern.permute.xlu1 %v2570_v1 }
  0x6d   :  { %984 = vperm.xlu1 %1361, %v918_v24   ;;  %451 = vperm.xlu0 %1383, %v1474_v8   ;;  %v757_v24 = vrot.slane %v23_v59, %v748_v63 }
  0x71   :  { %1362 = vset.pattern.permute.xlu1 %v2574_v0  ;;  %1389 = vset.pattern.permute.xlu0 %v2570_v1 }
  0x72   :  { %251 = vperm.xlu1 %1362, %v1508_v16   ;;  %939 = vperm.xlu0 %1389, %v909_v25   ;;  %v517_v25 = vrot.slane %v22_v58, %v516_v2 }
  0x74   :  { %v1704_v7 = vrot.slane %v517_v25, %v516_v2 }
  0x76   :  { %1363 = vset.pattern.permute.xlu1 %v2568_v15  ;;  %929 = vperm.xlu0 %1389, %v907_v26  }
  0x77   :  { %483 = vperm.xlu1 %1363, %v32_v23  }
  0x7a   :  { %1134 = vperm.xlu0 %1389, %v1131_v27   ;;  %v525_v27 = vrot.slane %v23_v59, %v516_v2 }
  0x7b   :  { %1364 = vset.pattern.permute.xlu1 %v2570_v1 }
  0x7c   :  { %979 = vperm.xlu1 %1364, %v917_v28   ;;  %v1708_v10 = vrot.slane %v525_v27, %v516_v2 }
  0x7d   :  { %v1582_v29 = vpop.permute.xlu0 %259  ;;  %v1584_v30 = vpop.permute.xlu1 %52 }
  0x7e   :  { %2607 = vst [vmem:[#allocation7_spill] sm:$0xff] %v1584_v30 }
  0x80   :  { %72 = vperm.xlu1 %1364, %v1449_v4   ;;  %v520_v4 = vsub.s32 6, %v1642_v51 }
  0x81   :  { %v1587_v31 = vpop.permute.xlu0 %247  ;;  %v1589_v32 = vpop.permute.xlu1 %57 }
  0x82   :  { %2608 = vst [vmem:[#allocation8_spill] sm:$0xff] %v1587_v31  ;;  %2609 = vst [vmem:[#allocation9_spill] sm:$0xff] %v1589_v32  ;;  %v521_v26 = vrot.slane %v22_v58, %v520_v4  ;;  %v529_v28 = vrot.slane %v23_v59, %v520_v4  ;;  %v1700_v4 = vrot.slane %v757_v24, %v744_v60 }
  0x84   :  { %1365 = vset.pattern.permute.xlu1 %v2568_v15  ;;  %v1710_v11 = vrot.slane %v529_v28, %v516_v2 }
  0x85   :  { %v1592_v33 = vpop.permute.xlu0 %231  ;;  %479 = vperm.xlu1 %1365, %v1508_v16  }
  0x86   :  { %2610 = vst [vmem:[#allocation10_spill] sm:$0xff] %v1592_v33  ;;  %v1595_v34 = vpop.permute.xlu1 %283 }
  0x89   :  { %1366 = vset.pattern.permute.xlu1 %v2572_v12 }
  0x8a   :  { %711 = vperm.xlu1 %1366, %v32_v23   ;;  %v1598_v35 = vpop.permute.xlu1 %279  ;;  %v1600_v36 = vpop.permute.xlu0 %42  ;;  %v749_v23 = vrot.slane %v22_v58, %v748_v63  ;;  %v1691_v58 = vrot.slane %v745_v20, %v744_v60  ;;  %v384_v20 = vmul.f32 %v1678_v48, %v1595_v34 }
  0x8b   :  { %2611 = vst [vmem:[#allocation11_spill] sm:$0xff] %v1600_v36  ;;  %v379_v24 = vmul.f32 %v1676_v54, %v1598_v35  ;;  %v381_v25 = vmul.f32 %v1680_v57, %v1598_v35 }
  0x8e   :  { %1367 = vset.pattern.permute.xlu1 %v2570_v1  ;;  %v1608_v38 = vpop.permute.xlu0 %47 }
  0x8f   :  { %2612 = vst [vmem:[#allocation12_spill] sm:$0xff] %v1608_v38  ;;  %67 = vperm.xlu1 %1367, %v1605_v37   ;;  %v1611_v39 = vpop.permute.xlu1 %107 }
  0x92   :  { %v1613_v40 = vpop.permute.xlu0 %117 }
  0x93   :  { %1368 = vset.pattern.permute.xlu1 %v2574_v0 }
  0x94   :  { %243 = vperm.xlu1 %1368, %v1605_v37   ;;  %v1617_v41 = vpop.permute.xlu1 %275 }
  0x95   :  { %v375_v38 = vmul.f32 %v1676_v54, %v1617_v41  ;;  %v376_v36 = vmul.f32 %v1678_v48, %v1617_v41  ;;  %v377_v32 = vmul.f32 %v1680_v57, %v1617_v41 }
  0x96   :  { %v1619_v42 = vpop.permute.xlu0 %112 }
  0x98   :  { %1369 = vset.pattern.permute.xlu1 %v2572_v12  ;;  %v1688_v12 = vrot.slane %v137_v17, %v124_v56  ;;  %v383_v17 = vmul.f32 %v1676_v54, %v1595_v34 }
  0x99   :  { %707 = vperm.xlu1 %1369, %v1508_v16   ;;  %v1623_v43 = vpop.permute.xlu1 %739  ;;  %v133_v16 = vrot.slane %v23_v59, %v124_v56  ;;  %v1693_v59 = vrot.slane %v753_v21, %v744_v60  ;;  %v385_v21 = vmul.f32 %v1680_v57, %v1595_v34 }
  0x9a   :  { %v1625_v44 = vpop.permute.xlu0 %102  ;;  %v217_v33 = vmul.f32 %v1688_v12, %v1619_v42  ;;  %v213_v8 = vmul.f32 %v1688_v12, %v1611_v39 }
  0x9b   :  { %2618 = vst [vmem:[#allocation18_spill] sm:$0xff] %v1693_v59 }
  0x9d   :  { %1370 = vset.pattern.permute.xlu1 %v2570_v1 }
  0x9e   :  { %969 = vperm.xlu1 %1370, %v915_v45   ;;  %v1631_v46 = vpop.permute.xlu1 %271  ;;  %v1633_v47 = vpop.permute.xlu0 %92  ;;  %v1674_v45 = vrot.slane %v289_v6, %v288_v53  ;;  %v1698_v53 = vrot.slane %v749_v23, %v744_v60  ;;  %v1722_v60 = vmul.f32 %v1678_v48, %v1582_v29 }
  0xa0   :  { %2622 = vst [vmem:[#allocation22_spill] sm:$0xff] %v1722_v60  ;;  %v378_v23 = vmul.f32 %v1674_v45, %v1598_v35 }
  0xa2   :  { %1371 = vset.pattern.permute.xlu1 %v2574_v0  ;;  %v1636_v49 = vpop.permute.xlu0 %989 }
  0xa3   :  { %2613 = vst [vmem:[#allocation13_spill] sm:$0xff] %v1636_v49  ;;  %239 = vperm.xlu1 %1371, %v1521_v19   ;;  %v1639_v50 = vpop.permute.xlu1 %503  ;;  %v441_v49 = vadd.f32 %v377_v32, %v213_v8  ;;  %v209_v32 = vmul.f32 %v1688_v12, %v1625_v44 }
  0xa6   :  { %v1644_v52 = vpop.permute.xlu0 %77 }
  0xa7   :  { %1372 = vset.pattern.permute.xlu1 %v2568_v15  ;;  %v1684_v15 = vrot.slane %v129_v14, %v124_v56  ;;  %v1718_v14 = vmul.f32 %v1676_v54, %v1582_v29 }
  0xa8   :  { %471 = vperm.xlu1 %1372, %v1605_v37   ;;  %v1650_v55 = vpop.permute.xlu1 %97 }
  0xa9   :  { %2621 = vst [vmem:[#allocation21_spill] sm:$0xff] %v1718_v14 }
  0xaa   :  { %v1661_v61 = vpop.permute.xlu0 %974 }
  0xab   :  { %2615 = vst [vmem:[#allocation15_spill] sm:$0xff] %v1661_v61 }
  0xac   :  { %1373 = vset.pattern.permute.xlu1 %v2570_v1  ;;  %v1686_v1 = vrot.slane %v133_v16, %v124_v56  ;;  %v1726_v16 = vmul.f32 %v1680_v57, %v1582_v29 }
  0xad   :  { %964 = vperm.xlu1 %1373, %v914_v62   ;;  %v1670_v18 = vpop.permute.xlu1 %267  ;;  %v1682_v62 = vrot.slane %v125_v13, %v124_v56  ;;  %v1706_v56 = vrot.slane %v521_v26, %v516_v2  ;;  %v1714_v13 = vmul.f32 %v1674_v45, %v1582_v29  ;;  %v382_v2 = vmul.f32 %v1674_v45, %v1595_v34 }
  0xae   :  { %2616 = vst [vmem:[#allocation16_spill] sm:$0xff] %v1670_v18  ;;  %v1672_v22 = vpop.permute.xlu0 %62  ;;  %2623 = vst [vmem:[#allocation23_spill] sm:$0xff] %v1726_v16  ;;  %v380_v29 = vmul.f32 %v1678_v48, %v1598_v35  ;;  %v2624_v26 = vmov 3   ;;  %v219_v34 = vmul.f32 %v1684_v15, %v1613_v40  ;;  %v220_v28 = vmul.f32 %v1686_v1, %v1613_v40 }
  0xaf   :  { %2617 = vst [vmem:[#allocation17_spill] sm:$0xff] %v1672_v22  ;;  %2620 = vst [vmem:[#allocation20_spill] sm:$0xff] %v1714_v13  ;;  %v218_v27 = vmul.f32 %v1682_v62, %v1613_v40  ;;  %v374_v35 = vmul.f32 %v1674_v45, %v1617_v41  ;;  %v216_v30 = vmul.f32 %v1686_v1, %v1619_v42 }
  0xb0   :  { %v210_v31 = vmul.f32 %v1682_v62, %v1611_v39  ;;  %v211_v41 = vmul.f32 %v1684_v15, %v1611_v39  ;;  %v212_v61 = vmul.f32 %v1686_v1, %v1611_v39  ;;  %v1787_v3 = vadd.f32 %v384_v20, %v220_v28 }
  0xb1   :  { %1374 = vset.pattern.permute.xlu1 %v2574_v0  ;;  %v221_v0 = vmul.f32 %v1688_v12, %v1613_v40  ;;  %v214_v40 = vmul.f32 %v1682_v62, %v1619_v42  ;;  %v1792_v16 = vadd.f32 %v383_v17, %v219_v34  ;;  %v1802_v20 = vadd.f32 %v380_v29, %v216_v30 }
  0xb2   :  { %235 = vperm.xlu1 %1374, %v1454_v5   ;;  %v1696_v63 = vpop.permute.xlu1 %731  ;;  %v1702_v6 = vpop.permute.xlu0 %954  ;;  %v438_v14 = vadd.f32 %v374_v35, %v210_v31  ;;  %v439_v13 = vadd.f32 %v375_v38, %v211_v41  ;;  %v440_v9 = vadd.f32 %v376_v36, %v212_v61  ;;  %v1808_v17 = vmul.f32 %v1691_v58, %v1623_v43 }
  0xb3   :  { %2619 = vst [vmem:[#allocation19_spill] sm:$0xff] %v1702_v6  ;;  %v913_v6 = vld [vmem:[%s2561_s3 + $0x38] sm:$0xff]  ;;  %v1794_v60 = vadd.f32 %v385_v21, %v221_v0  ;;  %v1798_v39 = vadd.f32 %v378_v23, %v214_v40  ;;  %2630 = vst [vmem:[#allocation28_spill] sm:$0xff] %v1802_v20  ;;  %v1812_v0 = vmul.f32 %v1693_v59, %v1623_v43  ;;  %v2636_v23 = vmov 2  }
  0xb4   :  { %2632 = vst [vmem:[#allocation30_spill] sm:$0xff] %v1808_v17  ;;  %v206_v8 = vmul.f32 %v1682_v62, %v1625_v44  ;;  %v207_v31 = vmul.f32 %v1684_v15, %v1625_v44  ;;  %v208_v30 = vmul.f32 %v1686_v1, %v1625_v44  ;;  %v1826_v36 = vmul.f32 %v1698_v53, %v1623_v43 }
  0xb5   :  { %2628 = vst [vmem:[#allocation26_spill] sm:$0xff] %v1798_v39  ;;  %2633 = vst [vmem:[#allocation31_spill] sm:$0xff] %v1812_v0  ;;  %v1830_v38 = vmul.f32 %v1700_v4, %v1623_v43  ;;  %v602_v61 = vmul.f32 %v1704_v7, %v1639_v50  ;;  %v604_v21 = vmul.f32 %v1708_v10, %v1639_v50 }
  0xb6   :  { %1375 = vset.pattern.permute.xlu1 %v2624_v26  ;;  %2634 = vst [vmem:[#allocation32_spill] sm:$0xff] %v1826_v36  ;;  %v605_v44 = vmul.f32 %v1710_v11, %v1639_v50  ;;  %v371_v43 = vmul.f32 %v1676_v54, %v1631_v46  ;;  %v372_v29 = vmul.f32 %v1678_v48, %v1631_v46 }
  0xb7   :  { %699 = vperm.xlu1 %1375, %v1605_v37   ;;  %v1754_v51 = vpop.permute.xlu1 %999  ;;  %v1756_v22 = vpop.permute.xlu0 %735  ;;  %v215_v37 = vmul.f32 %v1684_v15, %v1619_v42  ;;  %v2627_v42 = vmov 0   ;;  %2635 = vst [vmem:[#allocation33_spill] sm:$0xff] %v1830_v38  ;;  %v831_v28 = vmul.f32 %v1698_v53, %v1696_v63  ;;  %v832_v35 = vmul.f32 %v1693_v59, %v1696_v63 }
  0xb8   :  { %2625 = vst [vmem:[#allocation24_spill] sm:$0xff] %v1754_v51  ;;  %2626 = vst [vmem:[#allocation25_spill] sm:$0xff] %v1756_v22  ;;  %v1785_v51 = vadd.f32 %v382_v2, %v218_v27  ;;  %v1804_v27 = vadd.f32 %v381_v25, %v217_v33  ;;  %v373_v25 = vmul.f32 %v1680_v57, %v1631_v46 }
  0xb9   :  { %v1800_v2 = vadd.f32 %v379_v24, %v215_v37  ;;  %v370_v24 = vmul.f32 %v1674_v45, %v1631_v46  ;;  %v833_v40 = vmul.f32 %v1700_v4, %v1696_v63  ;;  %v1862_v37 = vmul.f32 %v1682_v62, %v1633_v47 }
  0xba   :  { %2631 = vst [vmem:[#allocation29_spill] sm:$0xff] %v1804_v27  ;;  %v1870_v46 = vmul.f32 %v1686_v1, %v1633_v47  ;;  %v1874_v41 = vmul.f32 %v1688_v12, %v1633_v47  ;;  %v666_v20 = vadd.f32 %v602_v61, %v438_v14  ;;  %v669_v39 = vadd.f32 %v605_v44, %v441_v49 }
  0xbb   :  { %1376 = vset.pattern.permute.xlu1 %v2627_v42  ;;  %v1790_v22 = vpop.permute.xlu0 %727  ;;  %2629 = vst [vmem:[#allocation27_spill] sm:$0xff] %v1800_v2  ;;  %v668_v2 = vadd.f32 %v604_v21, %v440_v9  ;;  %v1878_v0 = vadd.f32 %v370_v24, %v206_v8  ;;  %v1880_v17 = vadd.f32 %v371_v43, %v207_v31  ;;  %v2653_v44 = vmov 1   ;;  %v2654_v24 = vld [vmem:[#allocation13_spill] sm:$0xff] }
  0xbc   :  { %959 = vperm.xlu1 %1376, %v913_v6   ;;  %v1796_v18 = vpop.permute.xlu1 %263  ;;  %v603_v6 = vmul.f32 %v1706_v56, %v1639_v50  ;;  %v830_v50 = vmul.f32 %v1691_v58, %v1696_v63  ;;  %v1882_v38 = vadd.f32 %v372_v29, %v208_v30  ;;  %v1884_v36 = vadd.f32 %v373_v25, %v209_v32 }
  0xbd   :  { %v1892_v9 = vmul.f32 %v1682_v62, %v1644_v52  ;;  %v1896_v49 = vmul.f32 %v1684_v15, %v1644_v52  ;;  %v1900_v8 = vmul.f32 %v1686_v1, %v1644_v52  ;;  %v1922_v30 = vmul.f32 %v1688_v12, %v1650_v55 }
  0xbe   :  { %v667_v63 = vadd.f32 %v603_v6, %v439_v13  ;;  %v894_v14 = vadd.f32 %v830_v50, %v666_v20  ;;  %v896_v13 = vadd.f32 %v832_v35, %v668_v2  ;;  %v1914_v2 = vmul.f32 %v1684_v15, %v1650_v55 }
  0xbf   :  { %v1822_v33 = vpop.permute.xlu0 %715  ;;  %2639 = vst [vmem:[#allocation36_spill] sm:$0xff] %v1892_v9  ;;  %2640 = vst [vmem:[#allocation37_spill] sm:$0xff] %v1896_v49  ;;  %v1918_v20 = vmul.f32 %v1686_v1, %v1650_v55  ;;  %v2668_v49 = vld [vmem:[#allocation4_spill] sm:$0xff] }
  0xc0   :  { %1378 = vset.pattern.permute.xlu1 %v2636_v23  ;;  %2641 = vst [vmem:[#allocation38_spill] sm:$0xff] %v1900_v8  ;;  %2645 = vst [vmem:[#allocation42_spill] sm:$0xff] %v1914_v2  ;;  %v1948_v25 = vadd.f32 %v2654_v24, %v894_v14  ;;  %v1951_v50 = vadd.f32 %v2654_v24, %v896_v13  ;;  %v364_v14 = vmul.f32 %v1678_v48, %v1796_v18 }
  0xc1   :  { %463 = vperm.xlu1 %1378, %v1454_v5   ;;  %v1850_v34 = vpop.permute.xlu1 %495  ;;  %v1866_v5 = vmul.f32 %v1684_v15, %v1633_v47  ;;  %2646 = vst [vmem:[#allocation43_spill] sm:$0xff] %v1918_v20  ;;  %2647 = vst [vmem:[#allocation44_spill] sm:$0xff] %v1922_v30  ;;  %v365_v13 = vmul.f32 %v1680_v57, %v1796_v18  ;;  %v2657_v30 = vld [vmem:[#allocation21_spill] sm:$0xff] }
  0xc2   :  { %2637 = vst [vmem:[#allocation34_spill] sm:$0xff] %v1850_v34  ;;  %v895_v34 = vadd.f32 %v831_v28, %v667_v63 }
  0xc3   :  { %v1876_v27 = vpop.permute.xlu0 %703 }
  0xc4   :  { %2638 = vst [vmem:[#allocation35_spill] sm:$0xff] %v1876_v27  ;;  %v897_v27 = vadd.f32 %v833_v40, %v669_v39  ;;  %v1910_v39 = vmul.f32 %v1682_v62, %v1650_v55  ;;  %v1942_v43 = vadd.f32 %v2654_v24, %v895_v34  ;;  %v363_v34 = vmul.f32 %v1676_v54, %v1796_v18 }
  0xc5   :  { %1379 = vset.pattern.permute.xlu1 %v2624_v26 }
  0xc6   :  { %695 = vperm.xlu1 %1379, %v1521_v19   ;;  %v1888_v47 = vpop.permute.xlu1 %994  ;;  %v1904_v19 = vmul.f32 %v1688_v12, %v1644_v52  ;;  %2644 = vst [vmem:[#allocation41_spill] sm:$0xff] %v1910_v39  ;;  %v2648_v52 = vld [vmem:[#allocation16_spill] sm:$0xff]  ;;  %v1945_v29 = vadd.f32 %v2654_v24, %v897_v27  ;;  %v362_v27 = vmul.f32 %v1674_v45, %v1796_v18 }
  0xc7   :  { %v1906_v31 = vpop.permute.xlu0 %691  ;;  %v1926_v32 = vmul.f32 %v1674_v45, %v2648_v52  ;;  %v1930_v61 = vmul.f32 %v1676_v54, %v2648_v52  ;;  %v1934_v6 = vmul.f32 %v1678_v48, %v2648_v52  ;;  %v1938_v21 = vmul.f32 %v1680_v57, %v2648_v52  ;;  %v2655_v52 = vld [vmem:[#allocation6_spill] sm:$0xff] }
  0xc8   :  { %2642 = vst [vmem:[#allocation39_spill] sm:$0xff] %v1904_v19  ;;  %2643 = vst [vmem:[#allocation40_spill] sm:$0xff] %v1906_v31  ;;  %v2656_v31 = vld [vmem:[#allocation20_spill] sm:$0xff] }
  0xc9   :  { %2649 = vst [vmem:[#allocation16_spill] sm:$0xff] %v1926_v32  ;;  %2650 = vst [vmem:[#allocation45_spill] sm:$0xff] %v1930_v61  ;;  %v2661_v61 = vld [vmem:[#allocation23_spill] sm:$0xff]  ;;  %v2663_v32 = vld [vmem:[#allocation25_spill] sm:$0xff] }
  0xca   :  { %2651 = vst [vmem:[#allocation46_spill] sm:$0xff] %v1934_v6  ;;  %2652 = vst [vmem:[#allocation47_spill] sm:$0xff] %v1938_v21  ;;  %1381 = vset.pattern.permute.xlu1 %v2653_v44  ;;  %v88_v55 = vpop.permute.xlu1 %87  ;;  %v2659_v6 = vld [vmem:[#allocation22_spill] sm:$0xff]  ;;  %v1980_v39 = vmul.f32 %v1691_v58, %v2663_v32  ;;  %v1984_v18 = vmul.f32 %v1698_v53, %v2663_v32 }
  0xcb   :  { %v194_v28 = vmul.f32 %v1682_v62, %v88_v55  ;;  %v195_v35 = vmul.f32 %v1684_v15, %v88_v55  ;;  %v196_v40 = vmul.f32 %v1686_v1, %v88_v55  ;;  %v197_v63 = vmul.f32 %v1688_v12, %v88_v55  ;;  %227 = vperm.xlu1 %1381, %v2655_v52  }
  0xcc   :  { %v512_v24 = vpop.permute.xlu0 %511  ;;  %v426_v52 = vadd.f32 %v362_v27, %v1862_v37  ;;  %v911_v37 = vld [vmem:[%s2561_s3 + $0x28] sm:$0xff] }
  0xcd   :  { %v1967_v21 = vadd.f32 %v2656_v31, %v194_v28  ;;  %v1970_v55 = vadd.f32 %v2657_v30, %v195_v35  ;;  %v1973_v20 = vadd.f32 %v2659_v6, %v196_v40  ;;  %v1976_v2 = vadd.f32 %v2661_v61, %v197_v63 }
  0xce   :  { %v1988_v31 = vmul.f32 %v1693_v59, %v2663_v32  ;;  %v1992_v30 = vmul.f32 %v1700_v4, %v2663_v32  ;;  %v1996_v61 = vmul.f32 %v1691_v58, %v1790_v22  ;;  %v2000_v6 = vmul.f32 %v1698_v53, %v1790_v22 }
  0xcf   :  { %2658 = vst [vmem:[#allocation13_spill] sm:$0xff] %v1970_v55  ;;  %2660 = vst [vmem:[#allocation20_spill] sm:$0xff] %v1973_v20  ;;  %v2004_v28 = vmul.f32 %v1693_v59, %v1790_v22  ;;  %v2008_v35 = vmul.f32 %v1700_v4, %v1790_v22  ;;  %v492_v40 = vpop.permute.xlu1 %491  ;;  %1382 = vset.pattern.permute.xlu1 %v2636_v23  ;;  %v610_v32 = vmul.f32 %v1704_v7, %v512_v24 }
  0xd0   :  { %2662 = vst [vmem:[#allocation21_spill] sm:$0xff] %v1976_v2  ;;  %2664 = vst [vmem:[#allocation22_spill] sm:$0xff] %v1996_v61  ;;  %v611_v63 = vmul.f32 %v1706_v56, %v512_v24  ;;  %v612_v19 = vmul.f32 %v1708_v10, %v512_v24  ;;  %v613_v8 = vmul.f32 %v1710_v11, %v512_v24  ;;  %459 = vperm.xlu1 %1382, %v2668_v49   ;;  %v508_v9 = vpop.permute.xlu0 %507 }
  0xd1   :  { %2665 = vst [vmem:[#allocation23_spill] sm:$0xff] %v2000_v6  ;;  %2666 = vst [vmem:[#allocation25_spill] sm:$0xff] %v2004_v28  ;;  %v427_v20 = vadd.f32 %v363_v34, %v1866_v5  ;;  %v428_v22 = vadd.f32 %v364_v14, %v1870_v46  ;;  %v429_v2 = vadd.f32 %v365_v13, %v1874_v41 }
  0xd2   :  { %2667 = vst [vmem:[#allocation48_spill] sm:$0xff] %v2008_v35  ;;  %v2022_v23 = vmul.f32 %v1691_v58, %v1822_v33  ;;  %v2026_v55 = vmul.f32 %v1698_v53, %v1822_v33  ;;  %v590_v24 = vmul.f32 %v1704_v7, %v492_v40  ;;  %v591_v28 = vmul.f32 %v1706_v56, %v492_v40 }
  0xd3   :  { %v2035_v5 = vmul.f32 %v1693_v59, %v1822_v33  ;;  %v592_v46 = vmul.f32 %v1708_v10, %v492_v40  ;;  %v593_v41 = vmul.f32 %v1710_v11, %v492_v40  ;;  %v606_v27 = vmul.f32 %v1704_v7, %v508_v9  ;;  %v2674_v40 = vld [vmem:[#allocation34_spill] sm:$0xff] }
  0xd4   :  { %2669 = vst [vmem:[#allocation4_spill] sm:$0xff] %v2022_v23  ;;  %2670 = vst [vmem:[#allocation49_spill] sm:$0xff] %v2026_v55  ;;  %v2040_v34 = vpop.permute.xlu1 %723  ;;  %1384 = vset.pattern.permute.xlu1 %v2627_v42  ;;  %v500_v14 = vpop.permute.xlu0 %499  ;;  %v675_v13 = vadd.f32 %v611_v63, %v1792_v16  ;;  %v677_v23 = vadd.f32 %v613_v8, %v1794_v60  ;;  %v674_v55 = vadd.f32 %v610_v32, %v1785_v51  ;;  %v2678_v8 = vld [vmem:[#allocation32_spill] sm:$0xff]  ;;  %v2680_v63 = vld [vmem:[#allocation30_spill] sm:$0xff] }
  0xd5   :  { %2671 = vst [vmem:[#allocation50_spill] sm:$0xff] %v2035_v5  ;;  %2672 = vst [vmem:[#allocation51_spill] sm:$0xff] %v2040_v34  ;;  %v676_v61 = vadd.f32 %v612_v19, %v1787_v3  ;;  %v2049_v5 = vmul.f32 %v1700_v4, %v1822_v33  ;;  %v2053_v35 = vmul.f32 %v1704_v7, %v2674_v40  ;;  %949 = vperm.xlu1 %1384, %v911_v37   ;;  %v2679_v19 = vld [vmem:[#allocation33_spill] sm:$0xff]  ;;  %v2684_v37 = vld [vmem:[#allocation28_spill] sm:$0xff] }
  0xd6   :  { %v607_v34 = vmul.f32 %v1706_v56, %v508_v9  ;;  %v608_v42 = vmul.f32 %v1708_v10, %v508_v9  ;;  %v2057_v16 = vadd.f32 %v590_v24, %v426_v52  ;;  %v2059_v60 = vadd.f32 %v591_v28, %v427_v20  ;;  %v2682_v52 = vld [vmem:[#allocation26_spill] sm:$0xff]  ;;  %v2683_v28 = vld [vmem:[#allocation27_spill] sm:$0xff] }
  0xd7   :  { %2673 = vst [vmem:[#allocation52_spill] sm:$0xff] %v2049_v5  ;;  %2675 = vst [vmem:[#allocation53_spill] sm:$0xff] %v2053_v35  ;;  %v609_v51 = vmul.f32 %v1710_v11, %v508_v9  ;;  %v598_v3 = vmul.f32 %v1704_v7, %v500_v14  ;;  %v903_v33 = vadd.f32 %v2678_v8, %v675_v13  ;;  %v2681_v35 = vld [vmem:[#allocation31_spill] sm:$0xff] }
  0xd8   :  { %2676 = vst [vmem:[#allocation54_spill] sm:$0xff] %v2057_v16  ;;  %2677 = vst [vmem:[#allocation55_spill] sm:$0xff] %v2059_v60  ;;  %v905_v32 = vadd.f32 %v2679_v19, %v677_v23  ;;  %v902_v5 = vadd.f32 %v2680_v63, %v674_v55  ;;  %v904_v40 = vadd.f32 %v2681_v35, %v676_v61  ;;  %v2685_v60 = vld [vmem:[#allocation24_spill] sm:$0xff]  ;;  %v488_v8 = vpop.permute.xlu0 %487  ;;  %v2686_v61 = vld [vmem:[#allocation29_spill] sm:$0xff]  ;;  %v1121_v63 = vmax.f32 %v1945_v29, 0.0 }
  0xd9   :  { %v2067_v6 = vadd.f32 %v592_v46, %v428_v22  ;;  %v2069_v59 = vadd.f32 %v593_v41, %v429_v2  ;;  %v670_v24 = vadd.f32 %v606_v27, %v2682_v52  ;;  %v599_v20 = vmul.f32 %v1706_v56, %v500_v14  ;;  %v83_v55 = vpop.permute.xlu1 %82  ;;  %1385 = vset.pattern.permute.xlu1 %v2653_v44  ;;  %v2687_v41 = vld [vmem:[#allocation5_spill] sm:$0xff] }
  0xda   :  { %v671_v9 = vadd.f32 %v607_v34, %v2683_v28  ;;  %v672_v16 = vadd.f32 %v608_v42, %v2684_v37  ;;  %v1063_v13 = vadd.f32 %v2685_v60, %v903_v33  ;;  %v1065_v23 = vadd.f32 %v2685_v60, %v905_v32  ;;  %223 = vperm.xlu1 %1385, %v2687_v41  }
  0xdb   :  { %v673_v35 = vadd.f32 %v609_v51, %v2686_v61  ;;  %v600_v2 = vmul.f32 %v1708_v10, %v500_v14  ;;  %v1062_v22 = vadd.f32 %v2685_v60, %v902_v5  ;;  %v1064_v46 = vadd.f32 %v2685_v60, %v904_v40 }
  0xdc   :  { %v601_v42 = vmul.f32 %v1710_v11, %v500_v14  ;;  %v2085_v27 = vadd.f32 %v598_v3, %v1878_v0  ;;  %v1127_v34 = vmax.f32 %v1063_v13, 0.0  ;;  %v1129_v33 = vmax.f32 %v1065_v23, 0.0 }
  0xdd   :  { %v663_v19 = vadd.f32 %v599_v20, %v1880_v17  ;;  %v586_v44 = vmul.f32 %v1704_v7, %v488_v8  ;;  %v1126_v51 = vmax.f32 %v1062_v22, 0.0  ;;  %v1128_v32 = vmax.f32 %v1064_v46, 0.0 }
  0xde   :  { %1137 = vmatprep.subr.mxu0 %v1127_v34  ;;  %1208 = vmatprep.subr.mxu1 %v1129_v33  ;;  %v190_v5 = vmul.f32 %v1682_v62, %v83_v55  ;;  %v191_v40 = vmul.f32 %v1684_v15, %v83_v55  ;;  %v192_v60 = vmul.f32 %v1686_v1, %v83_v55  ;;  %v1119_v14 = vmax.f32 %v1942_v43, 0.0  ;;  %v256_v52 = vpop.permute.xlu1 %255 }
  0xdf   :  { %1138 = vmatpush1.msra.mxu0 %v1126_v51  ;;  %1209 = vmatpush1.msra.mxu1 %v1128_v32  ;;  %v193_v0 = vmul.f32 %v1688_v12, %v83_v55  ;;  %v899_v17 = vadd.f32 %v1984_v18, %v671_v9  ;;  %v901_v3 = vadd.f32 %v1992_v30, %v673_v35  ;;  %v1118_v51 = vmax.f32 %v1948_v25, 0.0  ;;  %v910_v25 = vld [vmem:[%s2561_s3 + $0x20] sm:$0xff] }
  0xe0   :  { %v898_v20 = vadd.f32 %v1980_v39, %v670_v24  ;;  %v900_v28 = vadd.f32 %v1988_v31, %v672_v16  ;;  %v354_v37 = vmul.f32 %v1674_v45, %v256_v52  ;;  %v355_v13 = vmul.f32 %v1676_v54, %v256_v52  ;;  %1386 = vset.pattern.permute.xlu1 %v2624_v26 }
  0xe1   :  { %v1059_v43 = vadd.f32 %v1888_v47, %v899_v17  ;;  %v1061_v23 = vadd.f32 %v1888_v47, %v901_v3  ;;  %v356_v18 = vmul.f32 %v1678_v48, %v256_v52  ;;  %v357_v30 = vmul.f32 %v1680_v57, %v256_v52  ;;  %687 = vperm.xlu1 %1386, %v2668_v49   ;;  %v2692_v3 = vld [vmem:[#allocation25_spill] sm:$0xff] }
  0xe2   :  { %v1058_v39 = vadd.f32 %v1888_v47, %v898_v20  ;;  %v1060_v29 = vadd.f32 %v1888_v47, %v900_v28  ;;  %v2109_v31 = vadd.f32 %v354_v37, %v190_v5  ;;  %v2111_v16 = vadd.f32 %v355_v13, %v191_v40  ;;  %v2694_v20 = vld [vmem:[#allocation21_spill] sm:$0xff] }
  0xe3   :  { %v1123_v24 = vmax.f32 %v1059_v43, 0.0  ;;  %v1125_v9 = vmax.f32 %v1061_v23, 0.0  ;;  %v2113_v55 = vadd.f32 %v356_v18, %v192_v60  ;;  %v2115_v61 = vadd.f32 %v357_v30, %v193_v0  ;;  %v720_v34 = vpop.permute.xlu1 %719  ;;  %v2689_v0 = vld [vmem:[#allocation23_spill] sm:$0xff] }
  0xe4   :  { %v664_v35 = vadd.f32 %v600_v2, %v1882_v38  ;;  %v665_v22 = vadd.f32 %v601_v42, %v1884_v36  ;;  %v1122_v46 = vmax.f32 %v1058_v39, 0.0  ;;  %v1124_v49 = vmax.f32 %v1060_v29, 0.0  ;;  %v2688_v42 = vld [vmem:[#allocation18_spill] sm:$0xff]  ;;  %v2696_v43 = vld [vmem:[#allocation55_spill] sm:$0xff] }
  0xe5   :  { %v587_v33 = vmul.f32 %v1706_v56, %v488_v8  ;;  %v589_v47 = vmul.f32 %v1710_v11, %v488_v8  ;;  %1139 = vmatprep.subr.mxu0 %v1123_v24  ;;  %1210 = vmatprep.subr.mxu1 %v1125_v9  ;;  %v819_v32 = vmul.f32 %v1698_v53, %v720_v34  ;;  %v1120_v36 = vmax.f32 %v1951_v50, 0.0  ;;  %v2691_v50 = vld [vmem:[#allocation22_spill] sm:$0xff]  ;;  %v2697_v24 = vld [vmem:[#allocation15_spill] sm:$0xff] }
  0xe6   :  { %v588_v5 = vmul.f32 %v1708_v10, %v488_v8  ;;  %v650_v40 = vadd.f32 %v586_v44, %v1967_v21  ;;  %1140 = vmatpush1.msra.mxu0 %v1122_v46  ;;  %1211 = vmatpush1.msra.mxu1 %v1124_v49  ;;  %v821_v38 = vmul.f32 %v1700_v4, %v720_v34  ;;  %v2690_v21 = vld [vmem:[#allocation48_spill] sm:$0xff]  ;;  %v2695_v37 = vmov 0  }
  0xe7   :  { %1141 = vmatprep.subr.mxu0 %v1119_v14  ;;  %1212 = vmatprep.subr.mxu1 %v1121_v63  ;;  %v818_v2 = vmul.f32 %v1691_v58, %v720_v34  ;;  %v820_v60 = vmul.f32 %v2688_v42, %v720_v34  ;;  %v891_v8 = vadd.f32 %v2689_v0, %v663_v19  ;;  %v2693_v63 = vld [vmem:[#allocation13_spill] sm:$0xff]  ;;  %v2699_v49 = vld [vmem:[#allocation20_spill] sm:$0xff] }
  0xe8   :  { %1142 = vmatpush1.msra.mxu0 %v1118_v51  ;;  %1213 = vmatpush1.msra.mxu1 %v1120_v36  ;;  %v893_v44 = vadd.f32 %v2690_v21, %v665_v22  ;;  %v890_v17 = vadd.f32 %v2691_v50, %v2085_v27  ;;  %v892_v14 = vadd.f32 %v2692_v3, %v664_v35  ;;  %v985_v13 = vpop.permute.xlu1 %984  ;;  %v2698_v35 = vld [vmem:[#allocation54_spill] sm:$0xff] }
  0xe9   :  { %v651_v52 = vadd.f32 %v587_v33, %v2693_v63  ;;  %v653_v28 = vadd.f32 %v589_v47, %v2694_v20  ;;  %1387 = vset.pattern.permute.xlu1 %v2695_v37  ;;  %v883_v23 = vadd.f32 %v819_v32, %v2696_v43  ;;  %v885_v19 = vadd.f32 %v821_v38, %v2069_v59  ;;  %v2700_v51 = vld [vmem:[#allocation34_spill] sm:$0xff]  ;;  %v2706_v20 = vld [vmem:[#allocation36_spill] sm:$0xff] }
  0xea   :  { %944 = vperm.xlu1 %1387, %v910_v25   ;;  %v1051_v18 = vadd.f32 %v985_v13, %v891_v8  ;;  %v1053_v30 = vadd.f32 %v985_v13, %v893_v44  ;;  %v1050_v39 = vadd.f32 %v985_v13, %v890_v17  ;;  %v1052_v29 = vadd.f32 %v985_v13, %v892_v14  ;;  %v2703_v8 = vld [vmem:[#allocation4_spill] sm:$0xff]  ;;  %v2704_v44 = vld [vmem:[#allocation6_spill] sm:$0xff]  ;;  %v2707_v13 = vld [vmem:[#allocation37_spill] sm:$0xff] }
  0xeb   :  { %v2143_v27 = vadd.f32 %v2697_v24, %v883_v23  ;;  %v2146_v9 = vadd.f32 %v2697_v24, %v885_v19  ;;  %v882_v22 = vadd.f32 %v818_v2, %v2698_v35  ;;  %v884_v46 = vadd.f32 %v820_v60, %v2067_v6  ;;  %v2701_v6 = vld [vmem:[#allocation49_spill] sm:$0xff]  ;;  %v2708_v23 = vld [vmem:[#allocation38_spill] sm:$0xff] }
  0xec   :  { %v652_v34 = vadd.f32 %v588_v5, %v2699_v49  ;;  %v1115_v33 = vmax.f32 %v1051_v18, 0.0  ;;  %v1117_v47 = vmax.f32 %v1053_v30, 0.0  ;;  %v1114_v59 = vmax.f32 %v1050_v39, 0.0  ;;  %v2702_v5 = vld [vmem:[#allocation52_spill] sm:$0xff]  ;;  %v2709_v18 = vld [vmem:[#allocation39_spill] sm:$0xff]  ;;  %v2710_v39 = vld [vmem:[#allocation41_spill] sm:$0xff] }
  0xed   :  { %v595_v32 = vmul.f32 %v1706_v56, %v2700_v51  ;;  %v1116_v36 = vmax.f32 %v1052_v29, 0.0  ;;  %v2154_v38 = vadd.f32 %v2697_v24, %v882_v22  ;;  %v2157_v25 = vadd.f32 %v2697_v24, %v884_v46  ;;  %v252_v2 = vpop.permute.xlu1 %251  ;;  %v2711_v29 = vld [vmem:[#allocation16_spill] sm:$0xff]  ;;  %v2712_v35 = vld [vmem:[#allocation42_spill] sm:$0xff]  ;;  %v2713_v22 = vld [vmem:[#allocation45_spill] sm:$0xff] }
  0xee   :  { %1388 = vset.pattern.permute.xlu1 %v2624_v26  ;;  %1143 = vmatprep.subr.mxu0 %v1115_v33  ;;  %v2161_v60 = vadd.f32 %v2701_v6, %v651_v52  ;;  %v2164_v0 = vadd.f32 %v2702_v5, %v653_v28  ;;  %v2167_v21 = vadd.f32 %v2703_v8, %v650_v40  ;;  %v2705_v40 = vld [vmem:[#allocation50_spill] sm:$0xff]  ;;  %v2714_v49 = vld [vmem:[#allocation43_spill] sm:$0xff] }
  0xef   :  { %683 = vperm.xlu1 %1388, %v2704_v44   ;;  %v350_v50 = vmul.f32 %v1674_v45, %v252_v2  ;;  %v351_v17 = vmul.f32 %v1676_v54, %v252_v2  ;;  %v352_v3 = vmul.f32 %v1678_v48, %v252_v2  ;;  %v353_v26 = vmul.f32 %v1680_v57, %v252_v2  ;;  %v2718_v2 = vld [vmem:[#allocation51_spill] sm:$0xff] }
  0xf0   :  { %v596_v14 = vmul.f32 %v1708_v10, %v2700_v51  ;;  %v597_v63 = vmul.f32 %v1710_v11, %v2700_v51  ;;  %1214 = vmatprep.subr.mxu1 %v1117_v47  ;;  %1144 = vmatpush1.msra.mxu0 %v1114_v59  ;;  %v2179_v52 = vadd.f32 %v2705_v40, %v652_v34  ;;  %v2715_v34 = vld [vmem:[#allocation46_spill] sm:$0xff]  ;;  %v2716_v47 = vld [vmem:[#allocation44_spill] sm:$0xff]  ;;  %v2717_v59 = vld [vmem:[#allocation47_spill] sm:$0xff] }
  0xf1   :  { %v2182_v28 = vadd.f32 %v350_v50, %v2706_v20  ;;  %v2185_v43 = vadd.f32 %v351_v17, %v2707_v13  ;;  %v2188_v19 = vadd.f32 %v352_v3, %v2708_v23  ;;  %v2191_v30 = vadd.f32 %v353_v26, %v2709_v18  ;;  %1215 = vmatpush1.msra.mxu1 %v1116_v36  ;;  %v2719_v50 = vld [vmem:[#allocation53_spill] sm:$0xff]  ;;  %v908_v20 = vld [vmem:[%s2561_s3 + $0x10] sm:$0xff] }
  0xf2   :  { %v430_v24 = vadd.f32 %v2711_v29, %v2710_v39  ;;  %v431_v46 = vadd.f32 %v2713_v22, %v2712_v35  ;;  %v432_v33 = vadd.f32 %v2715_v34, %v2714_v49  ;;  %v433_v51 = vadd.f32 %v2717_v59, %v2716_v47  ;;  %v2210_v44 = vpop.permute.xlu1 %483  ;;  %v2720_v29 = vld [vmem:[#allocation8_spill] sm:$0xff]  ;;  %v476_v22 = vpop.permute.xlu0 %475 }
  0xf3   :  { %v822_v6 = vmul.f32 %v1691_v58, %v2718_v2  ;;  %v823_v5 = vmul.f32 %v1698_v53, %v2718_v2  ;;  %v824_v36 = vmul.f32 %v2688_v42, %v2718_v2  ;;  %v825_v8 = vmul.f32 %v1700_v4, %v2718_v2  ;;  %679 = vperm.xlu1 %1388, %v2687_v41  }
  0xf4   :  { %v658_v17 = vadd.f32 %v2719_v50, %v430_v24  ;;  %v659_v3 = vadd.f32 %v595_v32, %v431_v46  ;;  %v660_v26 = vadd.f32 %v596_v14, %v432_v33  ;;  %v661_v40 = vadd.f32 %v597_v63, %v433_v51  ;;  %v906_v63 = vld [vmem:[%s2561_s3] sm:$0xff]  ;;  %v2721_v33 = vld [vmem:[#allocation35_spill] sm:$0xff] }
  0xf5   :  { %v346_v41 = vmul.f32 %v1674_v45, %v2720_v29  ;;  %v347_v35 = vmul.f32 %v1676_v54, %v2720_v29  ;;  %v348_v32 = vmul.f32 %v1678_v48, %v2720_v29  ;;  %v349_v34 = vmul.f32 %v1680_v57, %v2720_v29 }
  0xf6   :  { %v887_v13 = vadd.f32 %v823_v5, %v659_v3  ;;  %v889_v23 = vadd.f32 %v825_v8, %v661_v40  ;;  %v886_v18 = vadd.f32 %v822_v6, %v658_v17  ;;  %v888_v39 = vadd.f32 %v824_v36, %v660_v26 }
  0xf7   :  { %1390 = vset.pattern.permute.xlu1 %v2695_v37  ;;  %v980_v14 = vpop.permute.xlu1 %979  ;;  %v802_v47 = vmul.f32 %v1691_v58, %v2721_v33  ;;  %v803_v59 = vmul.f32 %v1698_v53, %v2721_v33  ;;  %v804_v51 = vmul.f32 %v2688_v42, %v2721_v33  ;;  %v574_v50 = vmul.f32 %v1704_v7, %v476_v22 }
  0xf8   :  { %934 = vperm.xlu1 %1390, %v908_v20   ;;  %v1047_v37 = vadd.f32 %v980_v14, %v887_v13  ;;  %v1049_v24 = vadd.f32 %v980_v14, %v889_v23  ;;  %v1046_v46 = vadd.f32 %v980_v14, %v886_v18  ;;  %v1048_v49 = vadd.f32 %v980_v14, %v888_v39 }
  0xf9   :  { %v575_v17 = vmul.f32 %v1706_v56, %v476_v22  ;;  %v576_v3 = vmul.f32 %v1708_v10, %v476_v22  ;;  %v577_v26 = vmul.f32 %v1710_v11, %v476_v22  ;;  %v805_v18 = vmul.f32 %v1700_v4, %v2721_v33 }
  0xfa   :  { %v1111_v2 = vmax.f32 %v1047_v37, 0.0  ;;  %v1113_v6 = vmax.f32 %v1049_v24, 0.0  ;;  %v1110_v5 = vmax.f32 %v1046_v46, 0.0  ;;  %v1112_v36 = vmax.f32 %v1048_v49, 0.0 }
  0xfb   :  { %v73_v8 = vpop.permute.xlu1 %72  ;;  %v1107_v39 = vmax.f32 %v2143_v27, 0.0  ;;  %v1109_v29 = vmax.f32 %v2146_v9, 0.0  ;;  %v1106_v14 = vmax.f32 %v2154_v38, 0.0  ;;  %v1108_v46 = vmax.f32 %v2157_v25, 0.0 }
  0xfc   :  { %924 = vperm.xlu1 %1390, %v906_v63   ;;  %v182_v40 = vmul.f32 %v1682_v62, %v73_v8  ;;  %v183_v20 = vmul.f32 %v1684_v15, %v73_v8  ;;  %v184_v13 = vmul.f32 %v1686_v1, %v73_v8  ;;  %v185_v23 = vmul.f32 %v1688_v12, %v73_v8 }
  0xfd   :  { %1145 = vmatprep.subr.mxu0 %v1111_v2  ;;  %1216 = vmatprep.subr.mxu1 %v1113_v6 }
  0xfe   :  { %1146 = vmatpush1.msra.mxu0 %v1110_v5  ;;  %v410_v63 = vadd.f32 %v346_v41, %v182_v40  ;;  %v411_v37 = vadd.f32 %v347_v35, %v183_v20  ;;  %v412_v24 = vadd.f32 %v348_v32, %v184_v13  ;;  %v413_v22 = vadd.f32 %v349_v34, %v185_v23 }
  0xff   :  { %1217 = vmatpush1.msra.mxu1 %v1112_v36  ;;  %1147 = vmatprep.subr.mxu0 %v1107_v39  ;;  %v1395_v35 = vmov 0.0   ;;  %v582_v13 = vmul.f32 %v1704_v7, %v2210_v44 }
 0x100   :  { %1218 = vmatprep.subr.mxu1 %v1109_v29  ;;  %v638_v49 = vadd.f32 %v574_v50, %v410_v63  ;;  %v639_v2 = vadd.f32 %v575_v17, %v411_v37  ;;  %v640_v33 = vadd.f32 %v576_v3, %v412_v24  ;;  %v641_v6 = vadd.f32 %v577_v26, %v413_v22  ;;  %v480_v5 = vpop.permute.xlu1 %479 }
 0x101   :  { %1148 = vmatpush1.msra.mxu0 %v1106_v14  ;;  %1219 = vmatpush1.msra.mxu1 %v1108_v46  ;;  %v646_v14 = vadd.f32 %v582_v13, %v2109_v31 }
 0x102   :  { %v2248_v27 = vadd.f32 %v803_v59, %v639_v2  ;;  %v2250_v9 = vadd.f32 %v805_v18, %v641_v6  ;;  %v2252_v38 = vadd.f32 %v802_v47, %v638_v49  ;;  %v2254_v41 = vadd.f32 %v804_v51, %v640_v33  ;;  %1201 = vmatprep.mubr.f32.mxu0 %v1395_v35 }
 0x103   :  { %1272 = vmatprep.mubr.f32.mxu1 %v1395_v35 }
 0x105   :  { %v712_v32 = vpop.permute.xlu1 %711 }
 0x106   :  { %v811_v23 = vmul.f32 %v1698_v53, %v712_v32  ;;  %v812_v18 = vmul.f32 %v2688_v42, %v712_v32  ;;  %v813_v39 = vmul.f32 %v1700_v4, %v712_v32 }
 0x10a   :  { %v2256_v25 = vpop.permute.xlu1 %67 }
 0x10f   :  { %v2258_v34 = vpop.permute.xlu1 %243 }
 0x114   :  { %v708_v36 = vpop.permute.xlu1 %707 }
 0x119   :  { %v970_v8 = vpop.permute.xlu1 %969 }
 0x11a   :  { %v1039_v50 = vadd.f32 %v970_v8, %v2161_v60  ;;  %v1041_v59 = vadd.f32 %v970_v8, %v2164_v0  ;;  %v1038_v17 = vadd.f32 %v970_v8, %v2167_v21  ;;  %v1040_v47 = vadd.f32 %v970_v8, %v2179_v52 }
 0x11b   :  { %v583_v60 = vmul.f32 %v1706_v56, %v2210_v44  ;;  %v584_v0 = vmul.f32 %v1708_v10, %v2210_v44  ;;  %v585_v21 = vmul.f32 %v1710_v11, %v2210_v44  ;;  %v810_v52 = vmul.f32 %v1691_v58, %v712_v32 }
 0x11c   :  { %v1103_v51 = vmax.f32 %v1039_v50, 0.0  ;;  %v1105_v3 = vmax.f32 %v1041_v59, 0.0  ;;  %v1102_v26 = vmax.f32 %v1038_v17, 0.0  ;;  %v1104_v40 = vmax.f32 %v1040_v47, 0.0 }
 0x11d   :  { %v647_v63 = vadd.f32 %v583_v60, %v2111_v16  ;;  %v648_v37 = vadd.f32 %v584_v0, %v2113_v55  ;;  %v649_v24 = vadd.f32 %v585_v21, %v2115_v61  ;;  %v874_v46 = vadd.f32 %v810_v52, %v646_v14 }
 0x11e   :  { %v2264_v20 = vpop.permute.xlu1 %239  ;;  %1149 = vmatprep.subr.mxu0 %v1103_v51  ;;  %1220 = vmatprep.subr.mxu1 %v1105_v3  ;;  %v578_v16 = vmul.f32 %v1704_v7, %v480_v5  ;;  %v579_v55 = vmul.f32 %v1706_v56, %v480_v5  ;;  %v580_v61 = vmul.f32 %v1708_v10, %v480_v5 }
 0x11f   :  { %1150 = vmatpush1.msra.mxu0 %v1102_v26  ;;  %1221 = vmatpush1.msra.mxu1 %v1104_v40  ;;  %v875_v22 = vadd.f32 %v811_v23, %v647_v63  ;;  %v877_v44 = vadd.f32 %v813_v39, %v649_v24  ;;  %v876_v49 = vadd.f32 %v812_v18, %v648_v37  ;;  %v2722_v63 = vld [vmem:[#allocation19_spill] sm:$0xff] }
 0x120   :  { %v581_v47 = vmul.f32 %v1710_v11, %v480_v5  ;;  %v806_v51 = vmul.f32 %v1691_v58, %v708_v36  ;;  %v807_v3 = vmul.f32 %v1698_v53, %v708_v36  ;;  %v808_v26 = vmul.f32 %v2688_v42, %v708_v36 }
 0x121   :  { %v809_v40 = vmul.f32 %v1700_v4, %v708_v36  ;;  %v642_v60 = vadd.f32 %v578_v16, %v2182_v28  ;;  %v643_v0 = vadd.f32 %v579_v55, %v2185_v43  ;;  %v644_v21 = vadd.f32 %v580_v61, %v2188_v19 }
 0x122   :  { %v645_v52 = vadd.f32 %v581_v47, %v2191_v30  ;;  %v1027_v37 = vadd.f32 %v2722_v63, %v2248_v27  ;;  %v1029_v28 = vadd.f32 %v2722_v63, %v2250_v9  ;;  %v1026_v43 = vadd.f32 %v2722_v63, %v2252_v38  ;;  %v2723_v38 = vld [vmem:[#allocation10_spill] sm:$0xff] }
 0x123   :  { %v2278_v29 = vpop.permute.xlu1 %471  ;;  %v871_v23 = vadd.f32 %v807_v3, %v643_v0  ;;  %v870_v18 = vadd.f32 %v806_v51, %v642_v60  ;;  %v872_v39 = vadd.f32 %v808_v26, %v644_v21  ;;  %v1028_v19 = vadd.f32 %v2722_v63, %v2254_v41  ;;  %v2725_v51 = vld [vmem:[#allocation9_spill] sm:$0xff] }
 0x124   :  { %v873_v5 = vadd.f32 %v809_v40, %v645_v52  ;;  %v1091_v27 = vmax.f32 %v1027_v37, 0.0  ;;  %v1090_v9 = vmax.f32 %v1026_v43, 0.0  ;;  %v330_v41 = vmul.f32 %v1674_v45, %v2723_v38  ;;  %v2727_v37 = vld [vmem:[#allocation11_spill] sm:$0xff] }
 0x125   :  { %v332_v16 = vmul.f32 %v1678_v48, %v2723_v38  ;;  %v333_v55 = vmul.f32 %v1680_v57, %v2723_v38  ;;  %v2330_v3 = vmul.f32 %v1682_v62, %v2725_v51  ;;  %v2334_v26 = vmul.f32 %v1684_v15, %v2725_v51 }
 0x126   :  { %v2338_v40 = vmul.f32 %v1686_v1, %v2725_v51  ;;  %v2342_v60 = vmul.f32 %v1688_v12, %v2725_v51  ;;  %v342_v52 = vmul.f32 %v1674_v45, %v2258_v34  ;;  %v570_v43 = vmul.f32 %v1704_v7, %v2278_v29 }
 0x128   :  { %v965_v2 = vpop.permute.xlu1 %964 }
 0x129   :  { %v1035_v33 = vadd.f32 %v965_v2, %v875_v22  ;;  %v1037_v6 = vadd.f32 %v965_v2, %v877_v44  ;;  %v1034_v35 = vadd.f32 %v965_v2, %v874_v46  ;;  %v1036_v8 = vadd.f32 %v965_v2, %v876_v49 }
 0x12b   :  { %v1099_v32 = vmax.f32 %v1035_v33, 0.0  ;;  %v1101_v50 = vmax.f32 %v1037_v6, 0.0  ;;  %v1098_v59 = vmax.f32 %v1034_v35, 0.0  ;;  %v1100_v17 = vmax.f32 %v1036_v8, 0.0 }
 0x12c   :  { %v1093_v6 = vmax.f32 %v1029_v28, 0.0  ;;  %v1092_v35 = vmax.f32 %v1028_v19, 0.0  ;;  %v331_v8 = vmul.f32 %v1676_v54, %v2723_v38  ;;  %v181_v28 = vmul.f32 %v1688_v12, %v2256_v25 }
 0x12d   :  { %v2284_v31 = vpop.permute.xlu1 %235  ;;  %1151 = vmatprep.subr.mxu0 %v1099_v32  ;;  %1222 = vmatprep.subr.mxu1 %v1101_v50  ;;  %v2724_v50 = vld [vmem:[#allocation7_spill] sm:$0xff]  ;;  %v571_v19 = vmul.f32 %v1706_v56, %v2278_v29 }
 0x12e   :  { %1152 = vmatpush1.msra.mxu0 %v1098_v59  ;;  %1223 = vmatpush1.msra.mxu1 %v1100_v17  ;;  %v166_v59 = vmul.f32 %v1682_v62, %v2724_v50  ;;  %v167_v17 = vmul.f32 %v1684_v15, %v2724_v50  ;;  %v168_v61 = vmul.f32 %v1686_v1, %v2724_v50 }
 0x12f   :  { %v169_v47 = vmul.f32 %v1688_v12, %v2724_v50  ;;  %v2728_v50 = vld [vmem:[#allocation12_spill] sm:$0xff] }
 0x130   :  { %v2344_v0 = vadd.f32 %v330_v41, %v166_v59  ;;  %v2346_v21 = vadd.f32 %v331_v8, %v167_v17  ;;  %v2402_v8 = vmul.f32 %v1688_v12, %v2727_v37  ;;  %v2406_v59 = vmul.f32 %v1682_v62, %v2728_v50 }
 0x131   :  { %v2360_v63 = vadd.f32 %v333_v55, %v169_v47  ;;  %v2410_v17 = vmul.f32 %v1684_v15, %v2728_v50  ;;  %v2414_v51 = vmul.f32 %v1686_v1, %v2728_v50 }
 0x132   :  { %v2294_v13 = vpop.permute.xlu1 %699 }
 0x133   :  { %2726 = vst [vmem:[#allocation32_spill] sm:$0xff] %v2360_v63  ;;  %v801_v38 = vmul.f32 %v1700_v4, %v2294_v13 }
 0x137   :  { %v960_v14 = vpop.permute.xlu1 %959 }
 0x138   :  { %v1031_v24 = vadd.f32 %v960_v14, %v871_v23  ;;  %v1033_v36 = vadd.f32 %v960_v14, %v873_v5  ;;  %v1030_v22 = vadd.f32 %v960_v14, %v870_v18  ;;  %v1032_v44 = vadd.f32 %v960_v14, %v872_v39 }
 0x139   :  { %v343_v23 = vmul.f32 %v1676_v54, %v2258_v34  ;;  %v344_v5 = vmul.f32 %v1678_v48, %v2258_v34  ;;  %v345_v18 = vmul.f32 %v1680_v57, %v2258_v34  ;;  %v2358_v14 = vadd.f32 %v332_v16, %v168_v61  ;;  %v468_v16 = vpop.permute.xlu0 %467 }
 0x13a   :  { %v1095_v30 = vmax.f32 %v1031_v24, 0.0  ;;  %v1097_v46 = vmax.f32 %v1033_v36, 0.0  ;;  %v1094_v49 = vmax.f32 %v1030_v22, 0.0  ;;  %v1096_v2 = vmax.f32 %v1032_v44, 0.0 }
 0x13b   :  { %v2364_v24 = vmul.f32 %v1682_v62, %v2727_v37  ;;  %v2368_v36 = vmul.f32 %v1684_v15, %v2727_v37  ;;  %v178_v22 = vmul.f32 %v1682_v62, %v2256_v25  ;;  %v179_v34 = vmul.f32 %v1684_v15, %v2256_v25 }
 0x13c   :  { %v2308_v33 = vpop.permute.xlu1 %463  ;;  %1153 = vmatprep.subr.mxu0 %v1095_v30  ;;  %1224 = vmatprep.subr.mxu1 %v1097_v46  ;;  %v180_v44 = vmul.f32 %v1686_v1, %v2256_v25  ;;  %v572_v30 = vmul.f32 %v1708_v10, %v2278_v29  ;;  %v573_v46 = vmul.f32 %v1710_v11, %v2278_v29 }
 0x13d   :  { %1154 = vmatpush1.msra.mxu0 %v1094_v49  ;;  %1225 = vmatpush1.msra.mxu1 %v1096_v2  ;;  %v406_v49 = vadd.f32 %v342_v52, %v178_v22  ;;  %v407_v2 = vadd.f32 %v343_v23, %v179_v34  ;;  %v799_v25 = vmul.f32 %v1698_v53, %v2294_v13  ;;  %v2729_v23 = vld [vmem:[#allocation17_spill] sm:$0xff] }
 0x13e   :  { %1155 = vmatprep.subr.mxu0 %v1091_v27  ;;  %1226 = vmatprep.subr.mxu1 %v1093_v6  ;;  %v408_v27 = vadd.f32 %v344_v5, %v180_v44  ;;  %v409_v6 = vadd.f32 %v345_v18, %v181_v28  ;;  %v2398_v29 = vmul.f32 %v1686_v1, %v2727_v37 }
 0x13f   :  { %1156 = vmatpush1.msra.mxu0 %v1090_v9  ;;  %1227 = vmatpush1.msra.mxu1 %v1092_v35  ;;  %v798_v9 = vmul.f32 %v1691_v58, %v2294_v13  ;;  %v800_v35 = vmul.f32 %v2688_v42, %v2294_v13  ;;  %v634_v13 = vadd.f32 %v570_v43, %v406_v49 }
 0x140   :  { %v635_v55 = vadd.f32 %v571_v19, %v407_v2  ;;  %v636_v61 = vadd.f32 %v572_v30, %v408_v27  ;;  %v637_v47 = vadd.f32 %v573_v46, %v409_v6  ;;  %v2418_v52 = vmul.f32 %v1688_v12, %v2728_v50 }
 0x141   :  { %v2314_v32 = vpop.permute.xlu1 %695  ;;  %v174_v5 = vmul.f32 %v1682_v62, %v2729_v23  ;;  %v175_v18 = vmul.f32 %v1684_v15, %v2729_v23  ;;  %v862_v34 = vadd.f32 %v798_v9, %v634_v13  ;;  %v176_v28 = vmul.f32 %v1686_v1, %v2729_v23  ;;  %v456_v62 = vpop.permute.xlu0 %455  ;;  %v2730_v13 = vld [vmem:[#allocation40_spill] sm:$0xff] }
 0x142   :  { %v863_v37 = vadd.f32 %v799_v25, %v635_v55  ;;  %v865_v22 = vadd.f32 %v801_v38, %v637_v47  ;;  %v864_v44 = vadd.f32 %v800_v35, %v636_v61  ;;  %v177_v43 = vmul.f32 %v1688_v12, %v2729_v23 }
 0x143   :  { %v335_v19 = vmul.f32 %v1676_v54, %v2284_v31  ;;  %v337_v30 = vmul.f32 %v1680_v57, %v2284_v31  ;;  %v334_v6 = vmul.f32 %v1674_v45, %v2284_v31  ;;  %v336_v1 = vmul.f32 %v1678_v48, %v2284_v31 }
 0x144   :  { %v563_v12 = vmul.f32 %v1706_v56, %v2308_v33  ;;  %v565_v9 = vmul.f32 %v1710_v11, %v2308_v33  ;;  %v790_v55 = vmul.f32 %v1691_v58, %v2730_v13  ;;  %v791_v61 = vmul.f32 %v1698_v53, %v2730_v13 }
 0x145   :  { %v338_v47 = vmul.f32 %v1674_v45, %v2264_v20  ;;  %v399_v31 = vadd.f32 %v335_v19, %v2334_v26  ;;  %v401_v23 = vadd.f32 %v337_v30, %v2342_v60  ;;  %v567_v26 = vmul.f32 %v1706_v56, %v468_v16  ;;  %v452_v19 = vpop.permute.xlu0 %451 }
 0x146   :  { %v2356_v39 = vpop.permute.xlu1 %227  ;;  %v398_v60 = vadd.f32 %v334_v6, %v2330_v3  ;;  %v400_v30 = vadd.f32 %v336_v1, %v2338_v40  ;;  %v554_v1 = vmul.f32 %v1704_v7, %v456_v62 }
 0x147   :  { %v402_v3 = vadd.f32 %v338_v47, %v174_v5 }
 0x14b   :  { %v2394_v41 = vpop.permute.xlu1 %459 }
 0x150   :  { %v950_v46 = vpop.permute.xlu1 %949 }
 0x151   :  { %v1023_v49 = vadd.f32 %v950_v46, %v863_v37  ;;  %v1025_v15 = vadd.f32 %v950_v46, %v865_v22  ;;  %v1022_v2 = vadd.f32 %v950_v46, %v862_v34  ;;  %v1024_v27 = vadd.f32 %v950_v46, %v864_v44 }
 0x152   :  { %v562_v37 = vmul.f32 %v1704_v7, %v2308_v33  ;;  %v564_v22 = vmul.f32 %v1708_v10, %v2308_v33  ;;  %v792_v34 = vmul.f32 %v2688_v42, %v2730_v13  ;;  %v793_v44 = vmul.f32 %v1700_v4, %v2730_v13 }
 0x153   :  { %v1087_v25 = vmax.f32 %v1023_v49, 0.0  ;;  %v1089_v35 = vmax.f32 %v1025_v15, 0.0  ;;  %v1086_v38 = vmax.f32 %v1022_v2, 0.0  ;;  %v1088_v50 = vmax.f32 %v1024_v27, 0.0 }
 0x154   :  { %v566_v46 = vmul.f32 %v1704_v7, %v468_v16  ;;  %v627_v49 = vadd.f32 %v563_v12, %v399_v31  ;;  %v629_v33 = vadd.f32 %v565_v9, %v401_v23  ;;  %v339_v15 = vmul.f32 %v1676_v54, %v2264_v20 }
 0x155   :  { %1157 = vmatprep.subr.mxu0 %v1087_v25  ;;  %1228 = vmatprep.subr.mxu1 %v1089_v35  ;;  %v341_v2 = vmul.f32 %v1680_v57, %v2264_v20  ;;  %v568_v27 = vmul.f32 %v1708_v10, %v468_v16  ;;  %v569_v25 = vmul.f32 %v1710_v11, %v468_v16  ;;  %v224_v35 = vpop.permute.xlu1 %223 }
 0x156   :  { %1158 = vmatpush1.msra.mxu0 %v1086_v38  ;;  %1229 = vmatpush1.msra.mxu1 %v1088_v50  ;;  %v340_v38 = vmul.f32 %v1678_v48, %v2264_v20  ;;  %v626_v6 = vadd.f32 %v562_v37, %v398_v60  ;;  %v628_v40 = vadd.f32 %v564_v22, %v400_v30  ;;  %v940_v37 = vpop.permute.xlu0 %939 }
 0x157   :  { %v555_v12 = vmul.f32 %v1706_v56, %v456_v62  ;;  %v2471_v9 = vmul.f32 %v1708_v10, %v456_v62  ;;  %v557_v50 = vmul.f32 %v1710_v11, %v456_v62  ;;  %v2475_v13 = vmul.f32 %v1704_v7, %v452_v19 }
 0x158   :  { %v2478_v16 = vmul.f32 %v1706_v56, %v452_v19  ;;  %v855_v31 = vadd.f32 %v791_v61, %v627_v49  ;;  %v857_v20 = vadd.f32 %v793_v44, %v629_v33  ;;  %v403_v5 = vadd.f32 %v339_v15, %v175_v18 }
 0x159   :  { %2731 = vst [vmem:[#allocation33_spill] sm:$0xff] %v2475_v13  ;;  %v405_v47 = vadd.f32 %v341_v2, %v177_v43  ;;  %v2481_v23 = vmul.f32 %v1708_v10, %v452_v19  ;;  %v327_v22 = vmul.f32 %v1676_v54, %v2356_v39  ;;  %v404_v60 = vadd.f32 %v340_v38, %v176_v28 }
 0x15a   :  { %2732 = vst [vmem:[#allocation30_spill] sm:$0xff] %v2478_v16  ;;  %v630_v30 = vadd.f32 %v566_v46, %v402_v3  ;;  %v854_v62 = vadd.f32 %v790_v55, %v626_v6  ;;  %v856_v63 = vadd.f32 %v792_v34, %v628_v40  ;;  %v794_v13 = vmul.f32 %v1691_v58, %v2314_v32 }
 0x15b   :  { %2733 = vst [vmem:[#allocation31_spill] sm:$0xff] %v2481_v23  ;;  %v795_v61 = vmul.f32 %v1698_v53, %v2314_v32  ;;  %v797_v18 = vmul.f32 %v1700_v4, %v2314_v32  ;;  %v329_v43 = vmul.f32 %v1680_v57, %v2356_v39  ;;  %v796_v28 = vmul.f32 %v2688_v42, %v2314_v32 }
 0x15c   :  { %v2493_v44 = vpop.permute.xlu1 %687  ;;  %v326_v55 = vmul.f32 %v1674_v45, %v2356_v39  ;;  %v1015_v34 = vadd.f32 %v940_v37, %v855_v31  ;;  %v1017_v46 = vadd.f32 %v940_v37, %v857_v20  ;;  %v631_v49 = vadd.f32 %v567_v26, %v403_v5 }
 0x15d   :  { %2734 = vst [vmem:[#allocation26_spill] sm:$0xff] %v2493_v44  ;;  %v633_v33 = vadd.f32 %v569_v25, %v405_v47  ;;  %v328_v15 = vmul.f32 %v1678_v48, %v2356_v39  ;;  %v391_v2 = vadd.f32 %v327_v22, %v2410_v17  ;;  %v632_v38 = vadd.f32 %v568_v27, %v404_v60 }
 0x15e   :  { %v2503_v3 = vmul.f32 %v1710_v11, %v452_v19  ;;  %v1014_v6 = vadd.f32 %v940_v37, %v854_v62  ;;  %v1016_v40 = vadd.f32 %v940_v37, %v856_v63  ;;  %v393_v32 = vadd.f32 %v329_v43, %v2418_v52  ;;  %v2735_v43 = vld [vmem:[#allocation32_spill] sm:$0xff] }
 0x15f   :  { %v859_v23 = vadd.f32 %v795_v61, %v631_v49  ;;  %v861_v16 = vadd.f32 %v797_v18, %v633_v33  ;;  %v858_v44 = vadd.f32 %v794_v13, %v630_v30  ;;  %v390_v31 = vadd.f32 %v326_v55, %v2406_v59  ;;  %v930_v33 = vpop.permute.xlu0 %929 }
 0x160   :  { %v860_v26 = vadd.f32 %v796_v28, %v632_v38  ;;  %v1079_v25 = vmax.f32 %v1015_v34, 0.0  ;;  %v1081_v20 = vmax.f32 %v1017_v46, 0.0  ;;  %v392_v39 = vadd.f32 %v328_v15, %v2414_v51  ;;  %v2737_v15 = vld [vmem:[#allocation33_spill] sm:$0xff] }
 0x161   :  { %v558_v17 = vmul.f32 %v1704_v7, %v2394_v41  ;;  %v322_v19 = vmul.f32 %v1674_v45, %v224_v35  ;;  %v619_v5 = vadd.f32 %v555_v12, %v391_v2  ;;  %v323_v13 = vmul.f32 %v1676_v54, %v224_v35  ;;  %v2738_v38 = vld [vmem:[#allocation30_spill] sm:$0xff] }
 0x162   :  { %v324_v59 = vmul.f32 %v1678_v48, %v224_v35  ;;  %v325_v22 = vmul.f32 %v1680_v57, %v224_v35  ;;  %v621_v60 = vadd.f32 %v557_v50, %v393_v32  ;;  %v559_v45 = vmul.f32 %v1706_v56, %v2394_v41 }
 0x163   :  { %v560_v7 = vmul.f32 %v1708_v10, %v2394_v41  ;;  %v561_v12 = vmul.f32 %v1710_v11, %v2394_v41  ;;  %v622_v54 = vadd.f32 %v558_v17, %v2344_v0  ;;  %v386_v48 = vadd.f32 %v322_v19, %v2364_v24 }
 0x164   :  { %v1078_v35 = vmax.f32 %v1014_v6, 0.0  ;;  %v620_v50 = vadd.f32 %v2471_v9, %v392_v39  ;;  %v387_v11 = vadd.f32 %v323_v13, %v2368_v36  ;;  %v388_v0 = vadd.f32 %v324_v59, %v2398_v29  ;;  %v2736_v28 = vld [vmem:[#allocation26_spill] sm:$0xff] }
 0x165   :  { %v945_v27 = vpop.permute.xlu1 %944  ;;  %v389_v24 = vadd.f32 %v325_v22, %v2402_v8  ;;  %v1080_v41 = vmax.f32 %v1016_v40, 0.0  ;;  %v624_v9 = vadd.f32 %v560_v7, %v2358_v14  ;;  %v786_v55 = vmul.f32 %v1691_v58, %v2736_v28  ;;  %v2739_v40 = vld [vmem:[#allocation31_spill] sm:$0xff] }
 0x166   :  { %v1019_v63 = vadd.f32 %v945_v27, %v859_v23  ;;  %v1021_v47 = vadd.f32 %v945_v27, %v861_v16  ;;  %v1018_v52 = vadd.f32 %v945_v27, %v858_v44  ;;  %v1020_v37 = vadd.f32 %v945_v27, %v860_v26 }
 0x167   :  { %v618_v16 = vadd.f32 %v554_v1, %v390_v31  ;;  %v623_v1 = vadd.f32 %v559_v45, %v2346_v21  ;;  %v625_v44 = vadd.f32 %v561_v12, %v2735_v43  ;;  %v787_v36 = vmul.f32 %v1698_v53, %v2736_v28 }
 0x168   :  { %v1083_v30 = vmax.f32 %v1019_v63, 0.0  ;;  %v1085_v51 = vmax.f32 %v1021_v47, 0.0  ;;  %v1082_v62 = vmax.f32 %v1018_v52, 0.0  ;;  %v1084_v61 = vmax.f32 %v1020_v37, 0.0 }
 0x169   :  { %v788_v29 = vmul.f32 %v2688_v42, %v2736_v28  ;;  %v789_v8 = vmul.f32 %v1700_v4, %v2736_v28  ;;  %v614_v2 = vadd.f32 %v2737_v15, %v386_v48  ;;  %v615_v6 = vadd.f32 %v2738_v38, %v387_v11  ;;  %v1130_v11 = vld [vmem:[%s2564_s4] sm:$0xff] }
 0x16a   :  { %v684_v57 = vpop.permute.xlu1 %683  ;;  %1159 = vmatprep.subr.mxu0 %v1083_v30  ;;  %1230 = vmatprep.subr.mxu1 %v1085_v51  ;;  %v616_v32 = vadd.f32 %v2739_v40, %v388_v0  ;;  %v617_v31 = vadd.f32 %v2503_v3, %v389_v24  ;;  %v851_v17 = vadd.f32 %v787_v36, %v623_v1  ;;  %v2740_v0 = vlaneseq }
 0x16b   :  { %v782_v23 = vmul.f32 %v1691_v58, %v684_v57  ;;  %v783_v56 = vmul.f32 %v1698_v53, %v684_v57  ;;  %v784_v10 = vmul.f32 %v2688_v42, %v684_v57  ;;  %v785_v18 = vmul.f32 %v1700_v4, %v684_v57  ;;  %1160 = vmatpush1.msra.mxu0 %v1082_v62 }
 0x16c   :  { %1231 = vmatpush1.msra.mxu1 %v1084_v61  ;;  %1161 = vmatprep.subr.mxu0 %v1079_v25  ;;  %v853_v19 = vadd.f32 %v789_v8, %v625_v44  ;;  %v850_v27 = vadd.f32 %v786_v55, %v622_v54  ;;  %v1281_v24 = vand.u32 127, %v2740_v0  ;;  %v1291_v43 = vstv %s2565_s0  ;;  %v1135_v55 = vpop.permute.xlu0 %1134 }
 0x16d   :  { %1232 = vmatprep.subr.mxu1 %v1081_v20  ;;  %1162 = vmatpush1.msra.mxu0 %v1078_v35  ;;  %v847_v34 = vadd.f32 %v783_v56, %v619_v5  ;;  %v849_v14 = vadd.f32 %v785_v18, %v621_v60  ;;  %v846_v46 = vadd.f32 %v782_v23, %v618_v16 }
 0x16e   :  { %1233 = vmatpush1.msra.mxu1 %v1080_v41  ;;  %v680_v21 = vpop.permute.xlu1 %679  ;;  %v848_v49 = vadd.f32 %v784_v10, %v620_v50  ;;  %v852_v5 = vadd.f32 %v788_v29, %v624_v9  ;;  %v1396_v41 = vmov 1983009808   ;;  %v1282_v9 = vadd.s32 128, %v1281_v24 }
 0x16f   :  { %v778_v26 = vmul.f32 %v1691_v58, %v680_v21  ;;  %v779_v25 = vmul.f32 %v1698_v53, %v680_v21  ;;  %v780_v20 = vmul.f32 %v2688_v42, %v680_v21  ;;  %v781_v39 = vmul.f32 %v1700_v4, %v680_v21 }
 0x170   :  { %v1007_v47 = vadd.f32 %v930_v33, %v847_v34  ;;  %v1009_v52 = vadd.f32 %v930_v33, %v849_v14  ;;  %v1006_v37 = vadd.f32 %v930_v33, %v846_v46  ;;  %v1008_v13 = vadd.f32 %v930_v33, %v848_v49  ;;  %v2741_v33 = vld [vmem:[#allocation14_spill] sm:$0xff] }
 0x171   :  { %v842_v58 = vadd.f32 %v778_v26, %v614_v2  ;;  %v843_v30 = vadd.f32 %v779_v25, %v615_v6  ;;  %v844_v53 = vadd.f32 %v780_v20, %v616_v32  ;;  %v845_v51 = vadd.f32 %v781_v39, %v617_v31 }
 0x172   :  { %v1071_v7 = vmax.f32 %v1007_v47, 0.0  ;;  %v1073_v57 = vmax.f32 %v1009_v52, 0.0  ;;  %v1070_v35 = vmax.f32 %v1006_v37, 0.0  ;;  %v1072_v50 = vmax.f32 %v1008_v13, 0.0 }
 0x173   :  { %v935_v63 = vpop.permute.xlu1 %934  ;;  %v1315_v1 = vunpack.c.l.s4 %v1396_v41  ;;  %v1283_v44 = vadd.s32 256, %v1281_v24  ;;  %v1284_v28 = vadd.s32 384, %v1281_v24  ;;  %vm1292_vm0 = vcmp.lt.s32.totalorder %v1281_v24, %v1291_v43 }
 0x174   :  { %v1011_v59 = vadd.f32 %v935_v63, %v851_v17  ;;  %v1013_v22 = vadd.f32 %v935_v63, %v853_v19  ;;  %v1010_v3 = vadd.f32 %v935_v63, %v850_v27  ;;  %v1012_v60 = vadd.f32 %v935_v63, %v852_v5 }
 0x175   :  { %v1316_v29 = vunpack.c.0.s8 %v1315_v1  ;;  %vm1293_vm1 = vcmp.lt.s32.totalorder %v1282_v9, %v1291_v43  ;;  %vm1294_vm2 = vcmp.lt.s32.totalorder %v1283_v44, %v1291_v43  ;;  %vm1295_vm3 = vcmp.lt.s32.totalorder %v1284_v28, %v1291_v43 }
 0x176   :  { %v1075_v42 = vmax.f32 %v1011_v59, 0.0  ;;  %v1077_v62 = vmax.f32 %v1013_v22, 0.0  ;;  %v1074_v4 = vmax.f32 %v1010_v3, 0.0  ;;  %v1076_v61 = vmax.f32 %v1012_v60, 0.0 }
 0x177   :  { %v925_v45 = vpop.permute.xlu1 %924  ;;  %v1319_v15 = vsub.s32 %v1316_v29, %v2741_v33 }
 0x178   :  { %v1002_v12 = vadd.f32 %v925_v45, %v842_v58  ;;  %v1003_v16 = vadd.f32 %v925_v45, %v843_v30  ;;  %v1004_v54 = vadd.f32 %v925_v45, %v844_v53  ;;  %v1005_v48 = vadd.f32 %v925_v45, %v845_v51  ;;  %1163 = vmatprep.subr.mxu0 %v1075_v42 }
 0x179   :  { %1234 = vmatprep.subr.mxu1 %v1077_v62  ;;  %1164 = vmatpush1.msra.mxu0 %v1074_v4 }
 0x17a   :  { %1235 = vmatpush1.msra.mxu1 %v1076_v61  ;;  %1165 = vmatprep.subr.mxu0 %v1071_v7  ;;  %v1067_v23 = vmax.f32 %v1003_v16, 0.0  ;;  %v1069_v56 = vmax.f32 %v1005_v48, 0.0  ;;  %v1066_v10 = vmax.f32 %v1002_v12, 0.0  ;;  %v1068_v18 = vmax.f32 %v1004_v54, 0.0 }
 0x17b   :  { %1236 = vmatprep.subr.mxu1 %v1073_v57  ;;  %1166 = vmatpush1.msra.mxu0 %v1070_v35 }
 0x17c   :  { %1237 = vmatpush1.msra.mxu1 %v1072_v50  ;;  %1167 = vmatprep.subr.mxu0 %v1067_v23 }
 0x17d   :  { %1238 = vmatprep.subr.mxu1 %v1069_v56  ;;  %1168 = vmatpush1.msra.mxu0 %v1066_v10 }
 0x17e   :  { %1239 = vmatpush1.msra.mxu1 %v1068_v18  ;;  %1202 = vmatmul.mubr.f32.vlgmr.msra.gmra.mxu0 %v1130_v11 }
 0x17f   :  { %1273 = vmatmul.mubr.f32.vlgmr.msra.gmra.mxu1 %v1130_v11 }
 0x23e   :  { %v1203_v36 = vpop.f32.mrf.mxu0 }
 0x23f   :  { %v1204_v8 = vadd.f32 %v1203_v36, %v1135_v55  ;;  %v1274_v21 = vpop.f32.mrf.mxu1 }
 0x240   :  { %v1275_v34 = vadd.f32 %v1274_v21, %v1135_v55  ;;  %v1205_v14 = vpop.f32.mrf.mxu0 }
 0x241   :  { %v1206_v46 = vadd.f32 %v1205_v14, %v1135_v55  ;;  %v1276_v49 = vpop.f32.mrf.mxu1  ;;  %v1304_v38 = vsel %vm1292_vm0, %v1204_v8, -1e+30 }
 0x242   :  { %v1277_v2 = vadd.f32 %v1276_v49, %v1135_v55  ;;  %v1306_v40 = vsel %vm1294_vm2, %v1275_v34, -1e+30 }
 0x243   :  { %v1305_v6 = vsel %vm1293_vm1, %v1206_v46, -1e+30 }
 0x244   :  { %v1312_v32 = vcombine.low %v1304_v38, %v1305_v6  ;;  %v1307_v31 = vsel %vm1295_vm3, %v1277_v2, -1e+30 }
 0x245   :  { %v1313_v26 = vcombine.low %v1306_v40, %v1307_v31 }
 0x246   :  { %v1320_v25 = vrot.slane %v1312_v32, %v1319_v15 }
 0x247   :  { %v1327_v20 = vrot.slane %v1313_v26, %v1319_v15 }
 0x249   :  { %v1328_v39 = vcombine.low %v1320_v25, %v1327_v20 }
 0x24b   :  { %1330 = vst [vmem:[%s2566_s6] sm:$0xff] %v1328_v39 }

</bundles_post_ra>
